<compile_context>
chip_gen: v5e
topology: v5e:2x2
jax: 0.10.0
libtpu: 0.0.40
codegen_flags: <defaults>
</compile_context>

<pallas_src>
import jax
import jax.numpy as jnp
import numpy as np
from jax import lax
from jax.experimental import pallas as pl
from jax.experimental.pallas import tpu as pltpu

LN_EPS = 1e-5  # PyTorch nn.LayerNorm default


def _round_up(v, m):
    return -(-v // m) * m


# ----------------------------- in-kernel helpers -----------------------------
def _silu(x):
    return x * jax.nn.sigmoid(x)


def _layernorm(x, gamma, beta):
    mean = jnp.mean(x, axis=-1, keepdims=True)
    var = jnp.mean((x - mean) ** 2, axis=-1, keepdims=True)
    return (x - mean) * lax.rsqrt(var + LN_EPS) * gamma + beta


def _ln_heads(z, avg, gamma, beta):
    """Per-head LayerNorm on a lane-flat [E, H*hidden] slab.

    `avg` is a [H*hidden, H*hidden] block matrix with 1/hidden inside each
    head-diagonal block, so `z @ avg` broadcasts each head's mean across that
    head's lanes (MXU work instead of lane-relayout reshapes)."""
    mean = jnp.dot(z, avg, preferred_element_type=jnp.float32)
    c = z - mean
    var = jnp.dot(c * c, avg, preferred_element_type=jnp.float32)
    return c * lax.rsqrt(var + LN_EPS) * gamma + beta


def _mlp3(x, w1, w2, w3, vec, b3):
    """Linear -> LN -> SiLU -> Linear -> LN -> SiLU -> Linear.

    Weights are bf16, dots accumulate in f32, LN/bias math in f32.
    `vec` rows are [b1, g1, bt1, b2, g2, bt2] packed into one [6, hidden]."""
    z = jnp.dot(x.astype(jnp.bfloat16), w1,
                preferred_element_type=jnp.float32) + vec[0:1, :]
    z = _silu(_layernorm(z, vec[1:2, :], vec[2:3, :]))
    z = jnp.dot(z.astype(jnp.bfloat16), w2,
                preferred_element_type=jnp.float32) + vec[3:4, :]
    z = _silu(_layernorm(z, vec[4:5, :], vec[5:6, :]))
    return jnp.dot(z.astype(jnp.bfloat16), w3,
                   preferred_element_type=jnp.float32) + b3


# ------------------------------- Pallas kernels -------------------------------
def _make_group_kernel(has_residual):
    """Fused EdgeInteraction layer-group: gather -> all-heads edge-MLP ->
    scatter-sum, accumulated over a 1-D grid of edge tiles into a resident
    [N_pad, OUT_PAD] output (residual folded into the init)."""

    def kernel(x_ref, ea_ref, gi_ref, gj_ref,
               w1a_ref, w1b_ref, w1c_ref, w2_ref, w3_ref, vec_ref, b3_ref,
               avg_ref, out_ref):
        @pl.when(pl.program_id(0) == 0)
        def _init():
            if has_residual:
                # For groups > 0 the residual is exactly the (padded) x input.
                out_ref[...] = x_ref[...]
            else:
                out_ref[...] = jnp.zeros_like(out_ref)

        gi = gi_ref[...]                    # bf16 one-hot (dst) -- no upcast
        gj = gj_ref[...]                    # bf16 one-hot (src)
        xb = x_ref[...].astype(jnp.bfloat16)

        # Shared gathers for all heads (one-hot matmuls on the MXU).  Row
        # selection is exact, so the bf16 result equals the bf16 x rows.
        xi = jnp.dot(gi, xb, preferred_element_type=jnp.float32).astype(jnp.bfloat16)
        xj = jnp.dot(gj, xb, preferred_element_type=jnp.float32).astype(jnp.bfloat16)

        vec = vec_ref[...]                  # f32 [6, H*hidden]
        avg = avg_ref[...]                  # f32 [H*hidden, H*hidden]

        # All heads fused: one set of W1 matmuls -> [tile_E, H*hidden].
        z = (jnp.dot(xi, w1a_ref[...], preferred_element_type=jnp.float32)
             + jnp.dot(xj, w1b_ref[...], preferred_element_type=jnp.float32)
             + jnp.dot(ea_ref[...], w1c_ref[...], preferred_element_type=jnp.float32)
             + vec[0:1, :])
        z = _silu(_ln_heads(z, avg, vec[1:2, :], vec[2:3, :]))
        z = jnp.dot(z.astype(jnp.bfloat16), w2_ref[...],
                    preferred_element_type=jnp.float32) + vec[3:4, :]
        z = _silu(_ln_heads(z, avg, vec[4:5, :], vec[5:6, :]))
        # Block-diagonal W3 writes every head's message into its slot of the
        # lane-dense (padded to 128) slab directly -- no concat.
        msg = (jnp.dot(z.astype(jnp.bfloat16), w3_ref[...],
                       preferred_element_type=jnp.float32) + b3_ref[...])

        # Scatter-sum to target nodes: contract the edge axis of gi with msg.
        out_ref[...] += lax.dot_general(
            gi, msg.astype(jnp.bfloat16),
            dimension_numbers=(((0,), (0,)), ((), ())),
            preferred_element_type=jnp.float32)

    return kernel


def _tail_kernel(h_ref, x_ref,
                 ew1, ew2, ew3, evec, eb3,
                 hw1, hw2, hw3, hvec, hb3,
                 fw1a, fw1b, fw2, fw3, fvec, fb3,
                 out_ref):
    """Fused galaxy_environment_mlp(h) | galaxy_halo_mlp(x) | fc(cat), tiled
    over nodes ("parallel" grid axis)."""
    env = _mlp3(h_ref[...], ew1[...], ew2[...], ew3[...], evec[...], eb3[...])
    halo = _mlp3(x_ref[...], hw1[...], hw2[...], hw3[...], hvec[...], hb3[...])
    fv = fvec[...]
    # fc first Linear on cat([env, halo], -1), expressed with split W1.
    z = (jnp.dot(env.astype(jnp.bfloat16), fw1a[...],
                 preferred_element_type=jnp.float32)
         + jnp.dot(halo.astype(jnp.bfloat16), fw1b[...],
                   preferred_element_type=jnp.float32)
         + fv[0:1, :])
    z = _silu(_layernorm(z, fv[1:2, :], fv[2:3, :]))
    z = jnp.dot(z.astype(jnp.bfloat16), fw2[...],
                preferred_element_type=jnp.float32) + fv[3:4, :]
    z = _silu(_layernorm(z, fv[4:5, :], fv[5:6, :]))
    out_ref[...] = (jnp.dot(z.astype(jnp.bfloat16), fw3[...],
                            preferred_element_type=jnp.float32) + fb3[...])


# --------------------------------- wrappers -----------------------------------
def _const_spec(arr, single_buffer):
    """Full-array block whose index never changes across the grid."""
    kw = dict(pipeline_mode=pl.Buffered(1)) if single_buffer else {}
    return pl.BlockSpec(arr.shape, lambda *_: (0,) * arr.ndim, **kw)


def group_call(x, ea, gi, gj, w, avg, *, has_residual, tile_e, vmem_limit,
               single_buffer):
    n_pad = x.shape[0]
    out_w = w["b3"].shape[1]
    e_pad = gi.shape[0]

    in_specs = [
        _const_spec(x, single_buffer),                               # node feats
        pl.BlockSpec((tile_e, ea.shape[1]), lambda e: (e, 0)),       # edge_attr
        pl.BlockSpec((tile_e, n_pad), lambda e: (e, 0)),             # gi (dst)
        pl.BlockSpec((tile_e, n_pad), lambda e: (e, 0)),             # gj (src)
    ]
    args = [x, ea, gi, gj]
    for name in ("w1a", "w1b", "w1c", "w2", "w3", "vec", "b3"):
        in_specs.append(_const_spec(w[name], single_buffer))
        args.append(w[name])
    in_specs.append(_const_spec(avg, single_buffer))
    args.append(avg)

    return pl.pallas_call(
        _make_group_kernel(has_residual),
        out_shape=jax.ShapeDtypeStruct((n_pad, out_w), jnp.float32),
        grid=(e_pad // tile_e,),
        in_specs=in_specs,
        out_specs=pl.BlockSpec((n_pad, out_w), lambda e: (0, 0)),
        compiler_params=pltpu.CompilerParams(
            dimension_semantics=("arbitrary",),
            vmem_limit_bytes=vmem_limit),
    )(*args)


def tail_call(h, x, env_p, halo_p, fc_p, *, tile_n, vmem_limit, single_buffer):
    n_pad = h.shape[0]
    out_w = fc_p["b3"].shape[1]

    in_specs = [pl.BlockSpec((tile_n, h.shape[1]), lambda i: (i, 0)),
                pl.BlockSpec((tile_n, x.shape[1]), lambda i: (i, 0))]
    args = [h, x]
    for p in (env_p, halo_p):
        for name in ("w1", "w2", "w3", "vec", "b3"):
            in_specs.append(_const_spec(p[name], single_buffer))
            args.append(p[name])
    for name in ("w1a", "w1b", "w2", "w3", "vec", "b3"):
        in_specs.append(_const_spec(fc_p[name], single_buffer))
        args.append(fc_p[name])

    return pl.pallas_call(
        _tail_kernel,
        out_shape=jax.ShapeDtypeStruct((n_pad, out_w), jnp.float32),
        grid=(n_pad // tile_n,),
        in_specs=in_specs,
        out_specs=pl.BlockSpec((tile_n, out_w), lambda i: (i, 0)),
        compiler_params=pltpu.CompilerParams(
            dimension_semantics=("parallel",),
            vmem_limit_bytes=vmem_limit),
    )(*args)


# ------------------------------ sizing helpers ---------------------------------
def _vmem_limit_bytes(frac=0.7, default=48 * 1024 * 1024):
    """Scoped-VMEM limit derived from the actual chip (v5e/v6e: 128 MiB,
    v7x: 64 MiB physical); falls back to a v7x-safe default."""
    try:
        return int(pltpu.get_tpu_info().vmem_capacity_bytes * frac)
    except Exception:
        return default


def _choose_edge_tile(n_edges, n_nodes_pad, ea_pad, vmem_limit, max_tile=512):
    """Largest multiple-of-16 edge tile whose double-buffered bf16 streams
    (gi, gj, edge_attr) fit in roughly a third of the VMEM budget."""
    budget = max(vmem_limit // 3, 1 << 20)

    def stream_bytes(t):
        return 2 * t * (2 * n_nodes_pad + ea_pad) * 2  # 2 bufs * bf16

    t = _round_up(min(max_tile, _round_up(max(n_edges, 16), 16)), 16)
    while t > 16 and stream_bytes(t) > budget:
        t -= 16
    return t, _round_up(max(n_edges, t), t)


def _choose_node_tile(n, max_tile=256):
    n8 = _round_up(max(n, 8), 8)
    if n8 <= max_tile:
        return n8, n8
    return max_tile, _round_up(n, max_tile)


def _pad_rows(a, rows):
    pad = rows - a.shape[0]
    return a if pad == 0 else jnp.pad(a, ((0, pad), (0, 0)))


# ------------------------------ top-level forward ------------------------------
def edge_interaction_gnn(x, edge_index, edge_attr, packed, *, max_edge_tile=512):
    """Full EdgeInteractionGNN.forward (aggr='sum', n_pool=1)."""
    dims = packed["dims"]
    n = x.shape[0]
    src, dst = edge_index[0], edge_index[1]

    tile_n, n_pad = _choose_node_tile(n)
    vmem_limit = _vmem_limit_bytes()
    tile_e, e_pad = _choose_edge_tile(edge_attr.shape[0], n_pad, dims["EAPAD"],
                                      vmem_limit, max_edge_tile)

    # bf16 one-hot gather/scatter matrices (0/1 exact in bf16; half the DMA).
    gj = _pad_rows(jax.nn.one_hot(src, n_pad, dtype=jnp.bfloat16), e_pad)
    gi = _pad_rows(jax.nn.one_hot(dst, n_pad, dtype=jnp.bfloat16), e_pad)
    xp = jnp.pad(x.astype(jnp.float32),
                 ((0, n_pad - n), (0, dims["XPAD"] - x.shape[1])))
    ea = _pad_rows(jnp.pad(edge_attr.astype(jnp.float32),
                           ((0, 0), (0, dims["EAPAD"] - edge_attr.shape[1])))
                   .astype(jnp.bfloat16), e_pad)

    def _run(single_buffer):
        avg = packed["head_avg"]
        h = group_call(xp, ea, gi, gj, packed["groups"][0], avg,
                       has_residual=False, tile_e=tile_e,
                       vmem_limit=vmem_limit, single_buffer=single_buffer)
        for g in packed["groups"][1:]:
            h = group_call(h, ea, gi, gj, g, avg, has_residual=True,
                           tile_e=tile_e, vmem_limit=vmem_limit,
                           single_buffer=single_buffer)
        out = tail_call(h, xp, packed["env"], packed["halo"], packed["fc"],
                        tile_n=tile_n, vmem_limit=vmem_limit,
                        single_buffer=single_buffer)
        return out[:n, :2 * dims["n_out"]]

    try:
        return _run(True)
    except Exception:
        # Fallback if pl.Buffered(1) single-buffering of constant blocks is
        # not supported by this jax version; semantics are identical.
        return _run(False)


# ------------------------------ parameter init --------------------------------
def init_linear(key, din, dout):
    kw, kb = jax.random.split(key)
    bound = 1.0 / np.sqrt(din)
    w = jax.random.uniform(kw, (din, dout), jnp.float32, -bound, bound)
    b = jax.random.uniform(kb, (1, dout), jnp.float32, -bound, bound)
    return w, b


def init_mlp3(key, din, dh, dout):
    k1, k2, k3 = jax.random.split(key, 3)
    w1, b1 = init_linear(k1, din, dh)
    w2, b2 = init_linear(k2, dh, dh)
    w3, b3 = init_linear(k3, dh, dout)
    ones = jnp.ones((1, dh), jnp.float32)
    zeros = jnp.zeros((1, dh), jnp.float32)
    return dict(w1=w1, b1=b1, g1=ones, bt1=zeros,
                w2=w2, b2=b2, g2=ones, bt2=zeros, w3=w3, b3=b3)


# ------------------------------ parameter packing ------------------------------
def pack_params(raw, node_features, edge_features, hidden, latent,
                n_unshared, n_out):
    HF = n_unshared * hidden          # fused hidden width (all heads)
    HW = n_unshared * latent          # h width
    XPAD = _round_up(node_features, 8)
    EAPAD = _round_up(edge_features, 8)
    HPAD = _round_up(HW, 128)         # lane-dense group output width
    OUTPAD = _round_up(2 * n_out, 128)

    def bf(a):
        return a.astype(jnp.bfloat16)

    def pad_rows(a, rows):
        return jnp.pad(a, ((0, rows - a.shape[0]), (0, 0)))

    def pad_cols(a, cols):
        return jnp.pad(a, ((0, 0), (0, cols - a.shape[1])))

    # Block-averaging matrix for the per-head (matmul-based) LayerNorm.
    head_of = np.repeat(np.arange(n_unshared), hidden)
    avg = jnp.asarray(
        (head_of[:, None] == head_of[None, :]).astype(np.float32) / hidden)

    groups = []
    for gidx, group in enumerate(raw["layers"]):
        node_w = node_features if gidx == 0 else HW
        in_pad = XPAD if gidx == 0 else HPAD
        w1a = jnp.concatenate([p["w1"][:node_w] for p in group], axis=1)
        w1b = jnp.concatenate([p["w1"][node_w:2 * node_w] for p in group], axis=1)
        w1c = jnp.concatenate([p["w1"][2 * node_w:] for p in group], axis=1)
        w2 = jnp.zeros((HF, HF), jnp.float32)
        w3 = jnp.zeros((HF, HPAD), jnp.float32)
        b3 = jnp.zeros((1, HPAD), jnp.float32)
        for h, p in enumerate(group):
            w2 = w2.at[h * hidden:(h + 1) * hidden,
                       h * hidden:(h + 1) * hidden].set(p["w2"])
            w3 = w3.at[h * hidden:(h + 1) * hidden,
                       h * latent:(h + 1) * latent].set(p["w3"])
            b3 = b3.at[:, h * latent:(h + 1) * latent].set(p["b3"])
        vec = jnp.concatenate(
            [jnp.concatenate([p[k] for p in group], axis=1)
             for k in ("b1", "g1", "bt1", "b2", "g2", "bt2")], axis=0)  # [6, HF]
        groups.append(dict(
            w1a=bf(pad_rows(w1a, in_pad)), w1b=bf(pad_rows(w1b, in_pad)),
            w1c=bf(pad_rows(w1c, EAPAD)), w2=bf(w2), w3=bf(w3),
            vec=vec, b3=b3))

    def pack_mlp(p, in_pad=None, out_pad=None):
        w1 = p["w1"] if in_pad is None else pad_rows(p["w1"], in_pad)
        w3, b3 = p["w3"], p["b3"]
        if out_pad is not None:
            w3, b3 = pad_cols(w3, out_pad), pad_cols(b3, out_pad)
        vec = jnp.concatenate([p["b1"], p["g1"], p["bt1"],
                               p["b2"], p["g2"], p["bt2"]], axis=0)
        return dict(w1=bf(w1), w2=bf(p["w2"]), w3=bf(w3), vec=vec, b3=b3)

    env = pack_mlp(raw["env"], in_pad=HPAD)
    halo = pack_mlp(raw["halo"], in_pad=XPAD)
    fcm = pack_mlp(raw["fc"], out_pad=OUTPAD)
    fc = dict(w1a=fcm["w1"][:latent], w1b=fcm["w1"][latent:],
              w2=fcm["w2"], w3=fcm["w3"], vec=fcm["vec"], b3=fcm["b3"])
    return dict(groups=groups, env=env, halo=halo, fc=fc, head_avg=avg,
                dims=dict(XPAD=XPAD, EAPAD=EAPAD, HPAD=HPAD, OUTPAD=OUTPAD,
                          n_out=n_out))


# ------------------------------ pure-JAX reference -----------------------------
def _ref_mlp3(x, p):
    def ln(v, g, b):
        m = v.mean(-1, keepdims=True)
        var = ((v - m) ** 2).mean(-1, keepdims=True)
        return (v - m) / jnp.sqrt(var + LN_EPS) * g + b
    h = x @ p["w1"] + p["b1"]
    h = jax.nn.silu(ln(h, p["g1"], p["bt1"]))
    h = h @ p["w2"] + p["b2"]
    h = jax.nn.silu(ln(h, p["g2"], p["bt2"]))
    return h @ p["w3"] + p["b3"]


def _ref_edge_layer(x, edge_index, edge_attr, p):
    src, dst = edge_index[0], edge_index[1]
    msg = _ref_mlp3(jnp.concatenate([x[dst], x[src], edge_attr], -1), p)
    return jnp.zeros((x.shape[0], msg.shape[1]), msg.dtype).at[dst].add(msg)


def _ref_forward(x, edge_index, edge_attr, params):
    h = jnp.concatenate([_ref_edge_layer(x, edge_index, edge_attr, p)
                         for p in params["layers"][0]], axis=1)
    for group in params["layers"][1:]:
        h = h + jnp.concatenate([_ref_edge_layer(h, edge_index, edge_attr, p)
                                 for p in group], axis=1)
    out = jnp.concatenate([_ref_mlp3(h, params["env"]),
                           _ref_mlp3(x, params["halo"])], axis=1)
    return _ref_mlp3(out, params["fc"])


# ----------------------------------- main --------------------------------------
if __name__ == "__main__":
    # small hyperparameters consistent with the module's __init__
    n_layers = 2
    node_features = 2
    edge_features = 6
    hidden_channels = 32
    latent_channels = 32
    n_out = 1
    n_unshared_layers = 2
    n_pool = 1  # aggr='sum'

    n_nodes = 16
    n_edges = 48

    key = jax.random.PRNGKey(0)
    k_x, k_ea, k_ei, k_params = jax.random.split(key, 4)

    x_hydro = jax.random.normal(k_x, (n_nodes, node_features), jnp.float32)
    edge_attr = jax.random.normal(k_ea, (n_edges, edge_features), jnp.float32)
    edge_index = jax.random.randint(k_ei, (2, n_edges), 0, n_nodes)

    n_in0 = 2 * node_features + edge_features
    n_in1 = n_pool * (2 * latent_channels * n_unshared_layers + edge_features)

    keys = jax.random.split(k_params, n_layers * n_unshared_layers + 3)
    layer_params, ki = [], 0
    for g in range(n_layers):
        din = n_in0 if g == 0 else n_in1
        group = []
        for _ in range(n_unshared_layers):
            group.append(init_mlp3(keys[ki], din, hidden_channels,
                                   latent_channels))
            ki += 1
        layer_params.append(group)

    raw_params = dict(
        layers=layer_params,
        env=init_mlp3(keys[ki], n_pool * n_unshared_layers * latent_channels,
                      hidden_channels, latent_channels),
        halo=init_mlp3(keys[ki + 1], node_features, hidden_channels,
                       latent_channels),
        fc=init_mlp3(keys[ki + 2], 2 * latent_channels, hidden_channels,
                     2 * n_out),
    )
    packed_params = pack_params(raw_params, node_features, edge_features,
                                hidden_channels, latent_channels,
                                n_unshared_layers, n_out)

    # max_edge_tile=16 here only to exercise the multi-step edge grid and the
    # resident accumulator on this toy graph; the default (512, VMEM-budgeted)
    # is the production setting per the perf review.
    out = jax.block_until_ready(
        edge_interaction_gnn(x_hydro, edge_index, edge_attr, packed_params,
                             max_edge_tile=16))
    ref = jax.block_until_ready(
        _ref_forward(x_hydro, edge_index, edge_attr, raw_params))

    assert out.shape == (n_nodes, 2 * n_out)
    # Tolerance relaxed vs. a pure-f32 check because matmul operands
    # (weights / activations / one-hots / messages) are deliberately bf16 on
    # the MXU (per the perf review); accumulation stays f32.
    np.testing.assert_allclose(np.asarray(out), np.asarray(ref),
                               rtol=3e-2, atol=3e-2)
    print("KERNEL_OK")
</pallas_src>

<mosaic_0001>
module attributes {stable_mosaic.version = 11 : i64} {
  func.func @kernel(%arg0: i32, %arg1: memref<16x8xf32, #tpu.memory_space<vmem>>, %arg2: memref<16x8xbf16, #tpu.memory_space<vmem>>, %arg3: memref<16x16xbf16, #tpu.memory_space<vmem>>, %arg4: memref<16x16xbf16, #tpu.memory_space<vmem>>, %arg5: memref<8x64xbf16, #tpu.memory_space<vmem>>, %arg6: memref<8x64xbf16, #tpu.memory_space<vmem>>, %arg7: memref<8x64xbf16, #tpu.memory_space<vmem>>, %arg8: memref<64x64xbf16, #tpu.memory_space<vmem>>, %arg9: memref<64x128xbf16, #tpu.memory_space<vmem>>, %arg10: memref<6x64xf32, #tpu.memory_space<vmem>>, %arg11: memref<1x128xf32, #tpu.memory_space<vmem>>, %arg12: memref<64x64xf32, #tpu.memory_space<vmem>>, %arg13: memref<16x128xf32, #tpu.memory_space<vmem>>) attributes {dimension_semantics = [#tpu.dimension_semantics<arbitrary>], iteration_bounds = array<i64: 3>, scalar_prefetch = 0 : i64, scratch_operands = 0 : i64, tpu.core_type = #tpu.core_type<tc>, window_params = [{pipeline_mode = #tpu.pipeline_mode<synchronous>, transform_indices = @transform_0, window_bounds = array<i64: 16, 8>}, {transform_indices = @transform_1, window_bounds = array<i64: 16, 8>}, {transform_indices = @transform_2, window_bounds = array<i64: 16, 16>}, {transform_indices = @transform_3, window_bounds = array<i64: 16, 16>}, {pipeline_mode = #tpu.pipeline_mode<synchronous>, transform_indices = @transform_4, window_bounds = array<i64: 8, 64>}, {pipeline_mode = #tpu.pipeline_mode<synchronous>, transform_indices = @transform_5, window_bounds = array<i64: 8, 64>}, {pipeline_mode = #tpu.pipeline_mode<synchronous>, transform_indices = @transform_6, window_bounds = array<i64: 8, 64>}, {pipeline_mode = #tpu.pipeline_mode<synchronous>, transform_indices = @transform_7, window_bounds = array<i64: 64, 64>}, {pipeline_mode = #tpu.pipeline_mode<synchronous>, transform_indices = @transform_8, window_bounds = array<i64: 64, 128>}, {pipeline_mode = #tpu.pipeline_mode<synchronous>, transform_indices = @transform_9, window_bounds = array<i64: 6, 64>}, {pipeline_mode = #tpu.pipeline_mode<synchronous>, transform_indices = @transform_10, window_bounds = array<i64: 1, 128>}, {pipeline_mode = #tpu.pipeline_mode<synchronous>, transform_indices = @transform_11, window_bounds = array<i64: 64, 64>}, {pipeline_mode = #tpu.pipeline_mode<synchronous>, transform_indices = @transform_12, window_bounds = array<i64: 16, 128>}]} {
    %c0_i32 = arith.constant 0 : i32
    %0 = arith.cmpi eq, %arg0, %c0_i32 : i32
    %1 = arith.extui %0 : i1 to i32
    %c0_i32_0 = arith.constant 0 : i32
    %2 = arith.cmpi ne, %1, %c0_i32_0 : i32
    scf.if %2 {
      %cst_43 = arith.constant 0.000000e+00 : f32
      %82 = vector.broadcast %cst_43 : f32 to vector<16x128xf32>
      %c0_44 = arith.constant 0 : index
      %c0_45 = arith.constant 0 : index
      %83 = vector.load %arg13[%c0_44, %c0_45] : memref<16x128xf32, #tpu.memory_space<vmem>>, vector<16x128xf32>
      tpu.vector_store %arg13[%c0_44, %c0_45], %82 {strides = array<i32>} : memref<16x128xf32, #tpu.memory_space<vmem>>, vector<16x128xf32>,
    } else {
    }
    %c0 = arith.constant 0 : index
    %c0_1 = arith.constant 0 : index
    %3 = vector.load %arg3[%c0, %c0_1] : memref<16x16xbf16, #tpu.memory_space<vmem>>, vector<16x16xbf16>
    %c0_2 = arith.constant 0 : index
    %c0_3 = arith.constant 0 : index
    %4 = vector.load %arg4[%c0_2, %c0_3] : memref<16x16xbf16, #tpu.memory_space<vmem>>, vector<16x16xbf16>
    %c0_4 = arith.constant 0 : index
    %c0_5 = arith.constant 0 : index
    %5 = vector.load %arg1[%c0_4, %c0_5] : memref<16x8xf32, #tpu.memory_space<vmem>>, vector<16x8xf32>
    %6 = arith.truncf %5 : vector<16x8xf32> to vector<16x8xbf16>
    %cst = arith.constant dense<0.000000e+00> : vector<16x8xf32>
    %7 = tpu.matmul %3, %6, %cst {dimension_numbers = #tpu.dot_dimension_numbers<[1], [0], [0], [1], [0, 0, 1, 1], [], []>} : vector<16x16xbf16>, vector<16x8xbf16>, vector<16x8xf32> -> vector<16x8xf32>
    %8 = arith.truncf %7 : vector<16x8xf32> to vector<16x8xbf16>
    %cst_6 = arith.constant dense<0.000000e+00> : vector<16x8xf32>
    %9 = tpu.matmul %4, %6, %cst_6 {dimension_numbers = #tpu.dot_dimension_numbers<[1], [0], [0], [1], [0, 0, 1, 1], [], []>} : vector<16x16xbf16>, vector<16x8xbf16>, vector<16x8xf32> -> vector<16x8xf32>
    %10 = arith.truncf %9 : vector<16x8xf32> to vector<16x8xbf16>
    %c0_7 = arith.constant 0 : index
    %c0_8 = arith.constant 0 : index
    %11 = vector.load %arg10[%c0_7, %c0_8] : memref<6x64xf32, #tpu.memory_space<vmem>>, vector<6x64xf32>
    %c0_9 = arith.constant 0 : index
    %c0_10 = arith.constant 0 : index
    %12 = vector.load %arg12[%c0_9, %c0_10] : memref<64x64xf32, #tpu.memory_space<vmem>>, vector<64x64xf32>
    %c0_11 = arith.constant 0 : index
    %c0_12 = arith.constant 0 : index
    %13 = vector.load %arg5[%c0_11, %c0_12] : memref<8x64xbf16, #tpu.memory_space<vmem>>, vector<8x64xbf16>
    %cst_13 = arith.constant dense<0.000000e+00> : vector<16x64xf32>
    %14 = tpu.matmul %8, %13, %cst_13 {dimension_numbers = #tpu.dot_dimension_numbers<[1], [0], [0], [1], [0, 0, 1, 1], [], []>} : vector<16x8xbf16>, vector<8x64xbf16>, vector<16x64xf32> -> vector<16x64xf32>
    %c0_14 = arith.constant 0 : index
    %c0_15 = arith.constant 0 : index
    %15 = vector.load %arg6[%c0_14, %c0_15] : memref<8x64xbf16, #tpu.memory_space<vmem>>, vector<8x64xbf16>
    %cst_16 = arith.constant dense<0.000000e+00> : vector<16x64xf32>
    %16 = tpu.matmul %10, %15, %cst_16 {dimension_numbers = #tpu.dot_dimension_numbers<[1], [0], [0], [1], [0, 0, 1, 1], [], []>} : vector<16x8xbf16>, vector<8x64xbf16>, vector<16x64xf32> -> vector<16x64xf32>
    %17 = arith.addf %14, %16 : vector<16x64xf32>
    %c0_17 = arith.constant 0 : index
    %c0_18 = arith.constant 0 : index
    %18 = vector.load %arg2[%c0_17, %c0_18] : memref<16x8xbf16, #tpu.memory_space<vmem>>, vector<16x8xbf16>
    %c0_19 = arith.constant 0 : index
    %c0_20 = arith.constant 0 : index
    %19 = vector.load %arg7[%c0_19, %c0_20] : memref<8x64xbf16, #tpu.memory_space<vmem>>, vector<8x64xbf16>
    %cst_21 = arith.constant dense<0.000000e+00> : vector<16x64xf32>
    %20 = tpu.matmul %18, %19, %cst_21 {dimension_numbers = #tpu.dot_dimension_numbers<[1], [0], [0], [1], [0, 0, 1, 1], [], []>} : vector<16x8xbf16>, vector<8x64xbf16>, vector<16x64xf32> -> vector<16x64xf32>
    %21 = arith.addf %17, %20 : vector<16x64xf32>
    %22 = vector.extract_strided_slice %11 {offsets = [0, 0], sizes = [1, 64], strides = [1, 1]} : vector<6x64xf32> to vector<1x64xf32>
    %23 = vector.broadcast %22 : vector<1x64xf32> to vector<16x64xf32>
    %24 = arith.addf %21, %23 : vector<16x64xf32>
    %25 = vector.extract_strided_slice %11 {offsets = [1, 0], sizes = [1, 64], strides = [1, 1]} : vector<6x64xf32> to vector<1x64xf32>
    %26 = vector.extract_strided_slice %11 {offsets = [2, 0], sizes = [1, 64], strides = [1, 1]} : vector<6x64xf32> to vector<1x64xf32>
    %cst_22 = arith.constant dense<0.000000e+00> : vector<16x64xf32>
    %27 = tpu.matmul %24, %12, %cst_22 {dimension_numbers = #tpu.dot_dimension_numbers<[1], [0], [0], [1], [0, 0, 1, 1], [], []>} : vector<16x64xf32>, vector<64x64xf32>, vector<16x64xf32> -> vector<16x64xf32>
    %28 = arith.subf %24, %27 : vector<16x64xf32>
    %29 = arith.mulf %28, %28 : vector<16x64xf32>
    %cst_23 = arith.constant dense<0.000000e+00> : vector<16x64xf32>
    %30 = tpu.matmul %29, %12, %cst_23 {dimension_numbers = #tpu.dot_dimension_numbers<[1], [0], [0], [1], [0, 0, 1, 1], [], []>} : vector<16x64xf32>, vector<64x64xf32>, vector<16x64xf32> -> vector<16x64xf32>
    %cst_24 = arith.constant 9.99999974E-6 : f32
    %31 = vector.broadcast %cst_24 : f32 to vector<16x64xf32>
    %32 = arith.addf %30, %31 : vector<16x64xf32>
    %33 = math.rsqrt %32 : vector<16x64xf32>
    %34 = arith.mulf %28, %33 : vector<16x64xf32>
    %35 = vector.broadcast %25 : vector<1x64xf32> to vector<16x64xf32>
    %36 = arith.mulf %34, %35 : vector<16x64xf32>
    %37 = vector.broadcast %26 : vector<1x64xf32> to vector<16x64xf32>
    %38 = arith.addf %36, %37 : vector<16x64xf32>
    %39 = arith.negf %38 : vector<16x64xf32>
    %40 = math.exp %39 : vector<16x64xf32>
    %cst_25 = arith.constant 1.000000e+00 : f32
    %41 = vector.broadcast %cst_25 : f32 to vector<16x64xf32>
    %42 = arith.addf %41, %40 : vector<16x64xf32>
    %43 = arith.divf %41, %42 : vector<16x64xf32>
    %44 = arith.mulf %38, %43 : vector<16x64xf32>
    %45 = arith.truncf %44 : vector<16x64xf32> to vector<16x64xbf16>
    %c0_26 = arith.constant 0 : index
    %c0_27 = arith.constant 0 : index
    %46 = vector.load %arg8[%c0_26, %c0_27] : memref<64x64xbf16, #tpu.memory_space<vmem>>, vector<64x64xbf16>
    %cst_28 = arith.constant dense<0.000000e+00> : vector<16x64xf32>
    %47 = tpu.matmul %45, %46, %cst_28 {dimension_numbers = #tpu.dot_dimension_numbers<[1], [0], [0], [1], [0, 0, 1, 1], [], []>} : vector<16x64xbf16>, vector<64x64xbf16>, vector<16x64xf32> -> vector<16x64xf32>
    %48 = vector.extract_strided_slice %11 {offsets = [3, 0], sizes = [1, 64], strides = [1, 1]} : vector<6x64xf32> to vector<1x64xf32>
    %49 = vector.broadcast %48 : vector<1x64xf32> to vector<16x64xf32>
    %50 = arith.addf %47, %49 : vector<16x64xf32>
    %51 = vector.extract_strided_slice %11 {offsets = [4, 0], sizes = [1, 64], strides = [1, 1]} : vector<6x64xf32> to vector<1x64xf32>
    %52 = vector.extract_strided_slice %11 {offsets = [5, 0], sizes = [1, 64], strides = [1, 1]} : vector<6x64xf32> to vector<1x64xf32>
    %cst_29 = arith.constant dense<0.000000e+00> : vector<16x64xf32>
    %53 = tpu.matmul %50, %12, %cst_29 {dimension_numbers = #tpu.dot_dimension_numbers<[1], [0], [0], [1], [0, 0, 1, 1], [], []>} : vector<16x64xf32>, vector<64x64xf32>, vector<16x64xf32> -> vector<16x64xf32>
    %54 = arith.subf %50, %53 : vector<16x64xf32>
    %55 = arith.mulf %54, %54 : vector<16x64xf32>
    %cst_30 = arith.constant dense<0.000000e+00> : vector<16x64xf32>
    %56 = tpu.matmul %55, %12, %cst_30 {dimension_numbers = #tpu.dot_dimension_numbers<[1], [0], [0], [1], [0, 0, 1, 1], [], []>} : vector<16x64xf32>, vector<64x64xf32>, vector<16x64xf32> -> vector<16x64xf32>
    %cst_31 = arith.constant 9.99999974E-6 : f32
    %57 = vector.broadcast %cst_31 : f32 to vector<16x64xf32>
    %58 = arith.addf %56, %57 : vector<16x64xf32>
    %59 = math.rsqrt %58 : vector<16x64xf32>
    %60 = arith.mulf %54, %59 : vector<16x64xf32>
    %61 = vector.broadcast %51 : vector<1x64xf32> to vector<16x64xf32>
    %62 = arith.mulf %60, %61 : vector<16x64xf32>
    %63 = vector.broadcast %52 : vector<1x64xf32> to vector<16x64xf32>
    %64 = arith.addf %62, %63 : vector<16x64xf32>
    %65 = arith.negf %64 : vector<16x64xf32>
    %66 = math.exp %65 : vector<16x64xf32>
    %cst_32 = arith.constant 1.000000e+00 : f32
    %67 = vector.broadcast %cst_32 : f32 to vector<16x64xf32>
    %68 = arith.addf %67, %66 : vector<16x64xf32>
    %69 = arith.divf %67, %68 : vector<16x64xf32>
    %70 = arith.mulf %64, %69 : vector<16x64xf32>
    %71 = arith.truncf %70 : vector<16x64xf32> to vector<16x64xbf16>
    %c0_33 = arith.constant 0 : index
    %c0_34 = arith.constant 0 : index
    %72 = vector.load %arg9[%c0_33, %c0_34] : memref<64x128xbf16, #tpu.memory_space<vmem>>, vector<64x128xbf16>
    %cst_35 = arith.constant dense<0.000000e+00> : vector<16x128xf32>
    %73 = tpu.matmul %71, %72, %cst_35 {dimension_numbers = #tpu.dot_dimension_numbers<[1], [0], [0], [1], [0, 0, 1, 1], [], []>} : vector<16x64xbf16>, vector<64x128xbf16>, vector<16x128xf32> -> vector<16x128xf32>
    %c0_36 = arith.constant 0 : index
    %c0_37 = arith.constant 0 : index
    %74 = vector.load %arg11[%c0_36, %c0_37] : memref<1x128xf32, #tpu.memory_space<vmem>>, vector<1x128xf32>
    %75 = vector.broadcast %74 : vector<1x128xf32> to vector<16x128xf32>
    %76 = arith.addf %73, %75 : vector<16x128xf32>
    %c0_38 = arith.constant 0 : index
    %c0_39 = arith.constant 0 : index
    %77 = vector.load %arg13[%c0_38, %c0_39] : memref<16x128xf32, #tpu.memory_space<vmem>>, vector<16x128xf32>
    %78 = arith.truncf %76 : vector<16x128xf32> to vector<16x128xbf16>
    %cst_40 = arith.constant dense<0.000000e+00> : vector<16x128xf32>
    %79 = tpu.matmul %3, %78, %cst_40 {dimension_numbers = #tpu.dot_dimension_numbers<[0], [0], [1], [1], [0, 1, 1, 1], [], []>} : vector<16x16xbf16>, vector<16x128xbf16>, vector<16x128xf32> -> vector<16x128xf32>
    %80 = arith.addf %77, %79 : vector<16x128xf32>
    %c0_41 = arith.constant 0 : index
    %c0_42 = arith.constant 0 : index
    %81 = vector.load %arg13[%c0_41, %c0_42] : memref<16x128xf32, #tpu.memory_space<vmem>>, vector<16x128xf32>
    tpu.vector_store %arg13[%c0_41, %c0_42], %80 {strides = array<i32>} : memref<16x128xf32, #tpu.memory_space<vmem>>, vector<16x128xf32>,
    return
  }
  func.func @transform_0(%arg0: i32) -> (i32, i32) {
    %c0_i32 = arith.constant 0 : i32
    %c0_i32_0 = arith.constant 0 : i32
    %c0_i32_1 = arith.constant 0 : i32
    return %c0_i32, %c0_i32_0 : i32, i32
  }
  func.func @transform_1(%arg0: i32) -> (i32, i32) {
    %c0_i32 = arith.constant 0 : i32
    %c0_i32_0 = arith.constant 0 : i32
    return %arg0, %c0_i32 : i32, i32
  }
  func.func @transform_2(%arg0: i32) -> (i32, i32) {
    %c0_i32 = arith.constant 0 : i32
    %c0_i32_0 = arith.constant 0 : i32
    return %arg0, %c0_i32 : i32, i32
  }
  func.func @transform_3(%arg0: i32) -> (i32, i32) {
    %c0_i32 = arith.constant 0 : i32
    %c0_i32_0 = arith.constant 0 : i32
    return %arg0, %c0_i32 : i32, i32
  }
  func.func @transform_4(%arg0: i32) -> (i32, i32) {
    %c0_i32 = arith.constant 0 : i32
    %c0_i32_0 = arith.constant 0 : i32
    %c0_i32_1 = arith.constant 0 : i32
    return %c0_i32, %c0_i32_0 : i32, i32
  }
  func.func @transform_5(%arg0: i32) -> (i32, i32) {
    %c0_i32 = arith.constant 0 : i32
    %c0_i32_0 = arith.constant 0 : i32
    %c0_i32_1 = arith.constant 0 : i32
    return %c0_i32, %c0_i32_0 : i32, i32
  }
  func.func @transform_6(%arg0: i32) -> (i32, i32) {
    %c0_i32 = arith.constant 0 : i32
    %c0_i32_0 = arith.constant 0 : i32
    %c0_i32_1 = arith.constant 0 : i32
    return %c0_i32, %c0_i32_0 : i32, i32
  }
  func.func @transform_7(%arg0: i32) -> (i32, i32) {
    %c0_i32 = arith.constant 0 : i32
    %c0_i32_0 = arith.constant 0 : i32
    %c0_i32_1 = arith.constant 0 : i32
    return %c0_i32, %c0_i32_0 : i32, i32
  }
  func.func @transform_8(%arg0: i32) -> (i32, i32) {
    %c0_i32 = arith.constant 0 : i32
    %c0_i32_0 = arith.constant 0 : i32
    %c0_i32_1 = arith.constant 0 : i32
    return %c0_i32, %c0_i32_0 : i32, i32
  }
  func.func @transform_9(%arg0: i32) -> (i32, i32) {
    %c0_i32 = arith.constant 0 : i32
    %c0_i32_0 = arith.constant 0 : i32
    %c0_i32_1 = arith.constant 0 : i32
    return %c0_i32, %c0_i32_0 : i32, i32
  }
  func.func @transform_10(%arg0: i32) -> (i32, i32) {
    %c0_i32 = arith.constant 0 : i32
    %c0_i32_0 = arith.constant 0 : i32
    %c0_i32_1 = arith.constant 0 : i32
    return %c0_i32, %c0_i32_0 : i32, i32
  }
  func.func @transform_11(%arg0: i32) -> (i32, i32) {
    %c0_i32 = arith.constant 0 : i32
    %c0_i32_0 = arith.constant 0 : i32
    %c0_i32_1 = arith.constant 0 : i32
    return %c0_i32, %c0_i32_0 : i32, i32
  }
  func.func @transform_12(%arg0: i32) -> (i32, i32) {
    %c0_i32 = arith.constant 0 : i32
    %c0_i32_0 = arith.constant 0 : i32
    %c0_i32_1 = arith.constant 0 : i32
    return %c0_i32, %c0_i32_0 : i32, i32
  }
}

module attributes {stable_mosaic.version = 11 : i64} {
  func.func @kernel(%arg0: i32, %arg1: memref<16x8xf32, #tpu.memory_space<vmem>>, %arg2: memref<16x8xbf16, #tpu.memory_space<vmem>>, %arg3: memref<16x16xbf16, #tpu.memory_space<vmem>>, %arg4: memref<16x16xbf16, #tpu.memory_space<vmem>>, %arg5: memref<8x64xbf16, #tpu.memory_space<vmem>>, %arg6: memref<8x64xbf16, #tpu.memory_space<vmem>>, %arg7: memref<8x64xbf16, #tpu.memory_space<vmem>>, %arg8: memref<64x64xbf16, #tpu.memory_space<vmem>>, %arg9: memref<64x128xbf16, #tpu.memory_space<vmem>>, %arg10: memref<6x64xf32, #tpu.memory_space<vmem>>, %arg11: memref<1x128xf32, #tpu.memory_space<vmem>>, %arg12: memref<64x64xf32, #tpu.memory_space<vmem>>, %arg13: memref<16x128xf32, #tpu.memory_space<vmem>>) attributes {dimension_semantics = [#tpu.dimension_semantics<arbitrary>], iteration_bounds = array<i64: 3>, scalar_prefetch = 0 : i64, scratch_operands = 0 : i64, tpu.core_type = #tpu.core_type<tc>, window_params = [{pipeline_mode = #tpu.pipeline_mode<synchronous>, transform_indices = @transform_0, window_bounds = array<i64: 16, 8>}, {transform_indices = @transform_1, window_bounds = array<i64: 16, 8>}, {transform_indices = @transform_2, window_bounds = array<i64: 16, 16>}, {transform_indices = @transform_3, window_bounds = array<i64: 16, 16>}, {pipeline_mode = #tpu.pipeline_mode<synchronous>, transform_indices = @transform_4, window_bounds = array<i64: 8, 64>}, {pipeline_mode = #tpu.pipeline_mode<synchronous>, transform_indices = @transform_5, window_bounds = array<i64: 8, 64>}, {pipeline_mode = #tpu.pipeline_mode<synchronous>, transform_indices = @transform_6, window_bounds = array<i64: 8, 64>}, {pipeline_mode = #tpu.pipeline_mode<synchronous>, transform_indices = @transform_7, window_bounds = array<i64: 64, 64>}, {pipeline_mode = #tpu.pipeline_mode<synchronous>, transform_indices = @transform_8, window_bounds = array<i64: 64, 128>}, {pipeline_mode = #tpu.pipeline_mode<synchronous>, transform_indices = @transform_9, window_bounds = array<i64: 6, 64>}, {pipeline_mode = #tpu.pipeline_mode<synchronous>, transform_indices = @transform_10, window_bounds = array<i64: 1, 128>}, {pipeline_mode = #tpu.pipeline_mode<synchronous>, transform_indices = @transform_11, window_bounds = array<i64: 64, 64>}, {pipeline_mode = #tpu.pipeline_mode<synchronous>, transform_indices = @transform_12, window_bounds = array<i64: 16, 128>}]} {
    %c0_i32 = arith.constant 0 : i32
    %0 = arith.cmpi eq, %arg0, %c0_i32 : i32
    %1 = arith.extui %0 : i1 to i32
    %c0_i32_0 = arith.constant 0 : i32
    %2 = arith.cmpi ne, %1, %c0_i32_0 : i32
    scf.if %2 {
      %cst_43 = arith.constant 0.000000e+00 : f32
      %82 = vector.broadcast %cst_43 : f32 to vector<16x128xf32>
      %c0_44 = arith.constant 0 : index
      %c0_45 = arith.constant 0 : index
      %83 = vector.load %arg13[%c0_44, %c0_45] : memref<16x128xf32, #tpu.memory_space<vmem>>, vector<16x128xf32>
      tpu.vector_store %arg13[%c0_44, %c0_45], %82 {strides = array<i32>} : memref<16x128xf32, #tpu.memory_space<vmem>>, vector<16x128xf32>,
    } else {
    }
    %c0 = arith.constant 0 : index
    %c0_1 = arith.constant 0 : index
    %3 = vector.load %arg3[%c0, %c0_1] : memref<16x16xbf16, #tpu.memory_space<vmem>>, vector<16x16xbf16>
    %c0_2 = arith.constant 0 : index
    %c0_3 = arith.constant 0 : index
    %4 = vector.load %arg4[%c0_2, %c0_3] : memref<16x16xbf16, #tpu.memory_space<vmem>>, vector<16x16xbf16>
    %c0_4 = arith.constant 0 : index
    %c0_5 = arith.constant 0 : index
    %5 = vector.load %arg1[%c0_4, %c0_5] : memref<16x8xf32, #tpu.memory_space<vmem>>, vector<16x8xf32>
    %6 = arith.truncf %5 : vector<16x8xf32> to vector<16x8xbf16>
    %cst = arith.constant dense<0.000000e+00> : vector<16x8xf32>
    %7 = tpu.matmul %3, %6, %cst {dimension_numbers = #tpu.dot_dimension_numbers<[1], [0], [0], [1], [0, 0, 1, 1], [], []>} : vector<16x16xbf16>, vector<16x8xbf16>, vector<16x8xf32> -> vector<16x8xf32>
    %8 = arith.truncf %7 : vector<16x8xf32> to vector<16x8xbf16>
    %cst_6 = arith.constant dense<0.000000e+00> : vector<16x8xf32>
    %9 = tpu.matmul %4, %6, %cst_6 {dimension_numbers = #tpu.dot_dimension_numbers<[1], [0], [0], [1], [0, 0, 1, 1], [], []>} : vector<16x16xbf16>, vector<16x8xbf16>, vector<16x8xf32> -> vector<16x8xf32>
    %10 = arith.truncf %9 : vector<16x8xf32> to vector<16x8xbf16>
    %c0_7 = arith.constant 0 : index
    %c0_8 = arith.constant 0 : index
    %11 = vector.load %arg10[%c0_7, %c0_8] : memref<6x64xf32, #tpu.memory_space<vmem>>, vector<6x64xf32>
    %c0_9 = arith.constant 0 : index
    %c0_10 = arith.constant 0 : index
    %12 = vector.load %arg12[%c0_9, %c0_10] : memref<64x64xf32, #tpu.memory_space<vmem>>, vector<64x64xf32>
    %c0_11 = arith.constant 0 : index
    %c0_12 = arith.constant 0 : index
    %13 = vector.load %arg5[%c0_11, %c0_12] : memref<8x64xbf16, #tpu.memory_space<vmem>>, vector<8x64xbf16>
    %cst_13 = arith.constant dense<0.000000e+00> : vector<16x64xf32>
    %14 = tpu.matmul %8, %13, %cst_13 {dimension_numbers = #tpu.dot_dimension_numbers<[1], [0], [0], [1], [0, 0, 1, 1], [], []>} : vector<16x8xbf16>, vector<8x64xbf16>, vector<16x64xf32> -> vector<16x64xf32>
    %c0_14 = arith.constant 0 : index
    %c0_15 = arith.constant 0 : index
    %15 = vector.load %arg6[%c0_14, %c0_15] : memref<8x64xbf16, #tpu.memory_space<vmem>>, vector<8x64xbf16>
    %cst_16 = arith.constant dense<0.000000e+00> : vector<16x64xf32>
    %16 = tpu.matmul %10, %15, %cst_16 {dimension_numbers = #tpu.dot_dimension_numbers<[1], [0], [0], [1], [0, 0, 1, 1], [], []>} : vector<16x8xbf16>, vector<8x64xbf16>, vector<16x64xf32> -> vector<16x64xf32>
    %17 = arith.addf %14, %16 : vector<16x64xf32>
    %c0_17 = arith.constant 0 : index
    %c0_18 = arith.constant 0 : index
    %18 = vector.load %arg2[%c0_17, %c0_18] : memref<16x8xbf16, #tpu.memory_space<vmem>>, vector<16x8xbf16>
    %c0_19 = arith.constant 0 : index
    %c0_20 = arith.constant 0 : index
    %19 = vector.load %arg7[%c0_19, %c0_20] : memref<8x64xbf16, #tpu.memory_space<vmem>>, vector<8x64xbf16>
    %cst_21 = arith.constant dense<0.000000e+00> : vector<16x64xf32>
    %20 = tpu.matmul %18, %19, %cst_21 {dimension_numbers = #tpu.dot_dimension_numbers<[1], [0], [0], [1], [0, 0, 1, 1], [], []>} : vector<16x8xbf16>, vector<8x64xbf16>, vector<16x64xf32> -> vector<16x64xf32>
    %21 = arith.addf %17, %20 : vector<16x64xf32>
    %22 = vector.extract_strided_slice %11 {offsets = [0, 0], sizes = [1, 64], strides = [1, 1]} : vector<6x64xf32> to vector<1x64xf32>
    %23 = vector.broadcast %22 : vector<1x64xf32> to vector<16x64xf32>
    %24 = arith.addf %21, %23 : vector<16x64xf32>
    %25 = vector.extract_strided_slice %11 {offsets = [1, 0], sizes = [1, 64], strides = [1, 1]} : vector<6x64xf32> to vector<1x64xf32>
    %26 = vector.extract_strided_slice %11 {offsets = [2, 0], sizes = [1, 64], strides = [1, 1]} : vector<6x64xf32> to vector<1x64xf32>
    %cst_22 = arith.constant dense<0.000000e+00> : vector<16x64xf32>
    %27 = tpu.matmul %24, %12, %cst_22 {dimension_numbers = #tpu.dot_dimension_numbers<[1], [0], [0], [1], [0, 0, 1, 1], [], []>} : vector<16x64xf32>, vector<64x64xf32>, vector<16x64xf32> -> vector<16x64xf32>
    %28 = arith.subf %24, %27 : vector<16x64xf32>
    %29 = arith.mulf %28, %28 : vector<16x64xf32>
    %cst_23 = arith.constant dense<0.000000e+00> : vector<16x64xf32>
    %30 = tpu.matmul %29, %12, %cst_23 {dimension_numbers = #tpu.dot_dimension_numbers<[1], [0], [0], [1], [0, 0, 1, 1], [], []>} : vector<16x64xf32>, vector<64x64xf32>, vector<16x64xf32> -> vector<16x64xf32>
    %cst_24 = arith.constant 9.99999974E-6 : f32
    %31 = vector.broadcast %cst_24 : f32 to vector<16x64xf32>
    %32 = arith.addf %30, %31 : vector<16x64xf32>
    %33 = math.rsqrt %32 : vector<16x64xf32>
    %34 = arith.mulf %28, %33 : vector<16x64xf32>
    %35 = vector.broadcast %25 : vector<1x64xf32> to vector<16x64xf32>
    %36 = arith.mulf %34, %35 : vector<16x64xf32>
    %37 = vector.broadcast %26 : vector<1x64xf32> to vector<16x64xf32>
    %38 = arith.addf %36, %37 : vector<16x64xf32>
    %39 = arith.negf %38 : vector<16x64xf32>
    %40 = math.exp %39 : vector<16x64xf32>
    %cst_25 = arith.constant 1.000000e+00 : f32
    %41 = vector.broadcast %cst_25 : f32 to vector<16x64xf32>
    %42 = arith.addf %41, %40 : vector<16x64xf32>
    %43 = arith.divf %41, %42 : vector<16x64xf32>
    %44 = arith.mulf %38, %43 : vector<16x64xf32>
    %45 = arith.truncf %44 : vector<16x64xf32> to vector<16x64xbf16>
    %c0_26 = arith.constant 0 : index
    %c0_27 = arith.constant 0 : index
    %46 = vector.load %arg8[%c0_26, %c0_27] : memref<64x64xbf16, #tpu.memory_space<vmem>>, vector<64x64xbf16>
    %cst_28 = arith.constant dense<0.000000e+00> : vector<16x64xf32>
    %47 = tpu.matmul %45, %46, %cst_28 {dimension_numbers = #tpu.dot_dimension_numbers<[1], [0], [0], [1], [0, 0, 1, 1], [], []>} : vector<16x64xbf16>, vector<64x64xbf16>, vector<16x64xf32> -> vector<16x64xf32>
    %48 = vector.extract_strided_slice %11 {offsets = [3, 0], sizes = [1, 64], strides = [1, 1]} : vector<6x64xf32> to vector<1x64xf32>
    %49 = vector.broadcast %48 : vector<1x64xf32> to vector<16x64xf32>
    %50 = arith.addf %47, %49 : vector<16x64xf32>
    %51 = vector.extract_strided_slice %11 {offsets = [4, 0], sizes = [1, 64], strides = [1, 1]} : vector<6x64xf32> to vector<1x64xf32>
    %52 = vector.extract_strided_slice %11 {offsets = [5, 0], sizes = [1, 64], strides = [1, 1]} : vector<6x64xf32> to vector<1x64xf32>
    %cst_29 = arith.constant dense<0.000000e+00> : vector<16x64xf32>
    %53 = tpu.matmul %50, %12, %cst_29 {dimension_numbers = #tpu.dot_dimension_numbers<[1], [0], [0], [1], [0, 0, 1, 1], [], []>} : vector<16x64xf32>, vector<64x64xf32>, vector<16x64xf32> -> vector<16x64xf32>
    %54 = arith.subf %50, %53 : vector<16x64xf32>
    %55 = arith.mulf %54, %54 : vector<16x64xf32>
    %cst_30 = arith.constant dense<0.000000e+00> : vector<16x64xf32>
    %56 = tpu.matmul %55, %12, %cst_30 {dimension_numbers = #tpu.dot_dimension_numbers<[1], [0], [0], [1], [0, 0, 1, 1], [], []>} : vector<16x64xf32>, vector<64x64xf32>, vector<16x64xf32> -> vector<16x64xf32>
    %cst_31 = arith.constant 9.99999974E-6 : f32
    %57 = vector.broadcast %cst_31 : f32 to vector<16x64xf32>
    %58 = arith.addf %56, %57 : vector<16x64xf32>
    %59 = math.rsqrt %58 : vector<16x64xf32>
    %60 = arith.mulf %54, %59 : vector<16x64xf32>
    %61 = vector.broadcast %51 : vector<1x64xf32> to vector<16x64xf32>
    %62 = arith.mulf %60, %61 : vector<16x64xf32>
    %63 = vector.broadcast %52 : vector<1x64xf32> to vector<16x64xf32>
    %64 = arith.addf %62, %63 : vector<16x64xf32>
    %65 = arith.negf %64 : vector<16x64xf32>
    %66 = math.exp %65 : vector<16x64xf32>
    %cst_32 = arith.constant 1.000000e+00 : f32
    %67 = vector.broadcast %cst_32 : f32 to vector<16x64xf32>
    %68 = arith.addf %67, %66 : vector<16x64xf32>
    %69 = arith.divf %67, %68 : vector<16x64xf32>
    %70 = arith.mulf %64, %69 : vector<16x64xf32>
    %71 = arith.truncf %70 : vector<16x64xf32> to vector<16x64xbf16>
    %c0_33 = arith.constant 0 : index
    %c0_34 = arith.constant 0 : index
    %72 = vector.load %arg9[%c0_33, %c0_34] : memref<64x128xbf16, #tpu.memory_space<vmem>>, vector<64x128xbf16>
    %cst_35 = arith.constant dense<0.000000e+00> : vector<16x128xf32>
    %73 = tpu.matmul %71, %72, %cst_35 {dimension_numbers = #tpu.dot_dimension_numbers<[1], [0], [0], [1], [0, 0, 1, 1], [], []>} : vector<16x64xbf16>, vector<64x128xbf16>, vector<16x128xf32> -> vector<16x128xf32>
    %c0_36 = arith.constant 0 : index
    %c0_37 = arith.constant 0 : index
    %74 = vector.load %arg11[%c0_36, %c0_37] : memref<1x128xf32, #tpu.memory_space<vmem>>, vector<1x128xf32>
    %75 = vector.broadcast %74 : vector<1x128xf32> to vector<16x128xf32>
    %76 = arith.addf %73, %75 : vector<16x128xf32>
    %c0_38 = arith.constant 0 : index
    %c0_39 = arith.constant 0 : index
    %77 = vector.load %arg13[%c0_38, %c0_39] : memref<16x128xf32, #tpu.memory_space<vmem>>, vector<16x128xf32>
    %78 = arith.truncf %76 : vector<16x128xf32> to vector<16x128xbf16>
    %cst_40 = arith.constant dense<0.000000e+00> : vector<16x128xf32>
    %79 = tpu.matmul %3, %78, %cst_40 {dimension_numbers = #tpu.dot_dimension_numbers<[0], [0], [1], [1], [0, 1, 1, 1], [], []>} : vector<16x16xbf16>, vector<16x128xbf16>, vector<16x128xf32> -> vector<16x128xf32>
    %80 = arith.addf %77, %79 : vector<16x128xf32>
    %c0_41 = arith.constant 0 : index
    %c0_42 = arith.constant 0 : index
    %81 = vector.load %arg13[%c0_41, %c0_42] : memref<16x128xf32, #tpu.memory_space<vmem>>, vector<16x128xf32>
    tpu.vector_store %arg13[%c0_41, %c0_42], %80 {strides = array<i32>} : memref<16x128xf32, #tpu.memory_space<vmem>>, vector<16x128xf32>,
    return
  }
  func.func @transform_0(%arg0: i32) -> (i32, i32) {
    %c0_i32 = arith.constant 0 : i32
    %c0_i32_0 = arith.constant 0 : i32
    %c0_i32_1 = arith.constant 0 : i32
    return %c0_i32, %c0_i32_0 : i32, i32
  }
  func.func @transform_1(%arg0: i32) -> (i32, i32) {
    %c0_i32 = arith.constant 0 : i32
    %c0_i32_0 = arith.constant 0 : i32
    return %arg0, %c0_i32 : i32, i32
  }
  func.func @transform_2(%arg0: i32) -> (i32, i32) {
    %c0_i32 = arith.constant 0 : i32
    %c0_i32_0 = arith.constant 0 : i32
    return %arg0, %c0_i32 : i32, i32
  }
  func.func @transform_3(%arg0: i32) -> (i32, i32) {
    %c0_i32 = arith.constant 0 : i32
    %c0_i32_0 = arith.constant 0 : i32
    return %arg0, %c0_i32 : i32, i32
  }
  func.func @transform_4(%arg0: i32) -> (i32, i32) {
    %c0_i32 = arith.constant 0 : i32
    %c0_i32_0 = arith.constant 0 : i32
    %c0_i32_1 = arith.constant 0 : i32
    return %c0_i32, %c0_i32_0 : i32, i32
  }
  func.func @transform_5(%arg0: i32) -> (i32, i32) {
    %c0_i32 = arith.constant 0 : i32
    %c0_i32_0 = arith.constant 0 : i32
    %c0_i32_1 = arith.constant 0 : i32
    return %c0_i32, %c0_i32_0 : i32, i32
  }
  func.func @transform_6(%arg0: i32) -> (i32, i32) {
    %c0_i32 = arith.constant 0 : i32
    %c0_i32_0 = arith.constant 0 : i32
    %c0_i32_1 = arith.constant 0 : i32
    return %c0_i32, %c0_i32_0 : i32, i32
  }
  func.func @transform_7(%arg0: i32) -> (i32, i32) {
    %c0_i32 = arith.constant 0 : i32
    %c0_i32_0 = arith.constant 0 : i32
    %c0_i32_1 = arith.constant 0 : i32
    return %c0_i32, %c0_i32_0 : i32, i32
  }
  func.func @transform_8(%arg0: i32) -> (i32, i32) {
    %c0_i32 = arith.constant 0 : i32
    %c0_i32_0 = arith.constant 0 : i32
    %c0_i32_1 = arith.constant 0 : i32
    return %c0_i32, %c0_i32_0 : i32, i32
  }
  func.func @transform_9(%arg0: i32) -> (i32, i32) {
    %c0_i32 = arith.constant 0 : i32
    %c0_i32_0 = arith.constant 0 : i32
    %c0_i32_1 = arith.constant 0 : i32
    return %c0_i32, %c0_i32_0 : i32, i32
  }
  func.func @transform_10(%arg0: i32) -> (i32, i32) {
    %c0_i32 = arith.constant 0 : i32
    %c0_i32_0 = arith.constant 0 : i32
    %c0_i32_1 = arith.constant 0 : i32
    return %c0_i32, %c0_i32_0 : i32, i32
  }
  func.func @transform_11(%arg0: i32) -> (i32, i32) {
    %c0_i32 = arith.constant 0 : i32
    %c0_i32_0 = arith.constant 0 : i32
    %c0_i32_1 = arith.constant 0 : i32
    return %c0_i32, %c0_i32_0 : i32, i32
  }
  func.func @transform_12(%arg0: i32) -> (i32, i32) {
    %c0_i32 = arith.constant 0 : i32
    %c0_i32_0 = arith.constant 0 : i32
    %c0_i32_1 = arith.constant 0 : i32
    return %c0_i32, %c0_i32_0 : i32, i32
  }
}

</mosaic_0001>

<bundles_post_ra>
// kernel: tpu_custom_call.1
= control target key start
LH: loop header
LB: loop body
LE: loop exit
PB: predicated region body
PF: predicated region fallthrough
CT: control target
= control target key end

     0   :  { %17 = vsyncpa [#allocation3], 0  ;;  %s1503_s0 = inlined_call_operand.vmem [shape: f32[16,8], index: 0, kind: input, shape index: {}]   ;;  %s1504_s1 = inlined_call_operand.vmem [shape: bf16[48,8], index: 1, kind: input, shape index: {}]   ;;  %s1505_s2 = inlined_call_operand.vmem [shape: bf16[48,16], index: 2, kind: input, shape index: {}]   ;;  %s1506_s3 = inlined_call_operand.vmem [shape: bf16[48,16], index: 3, kind: input, shape index: {}]   ;;  %s1507_s4 = inlined_call_operand.vmem [shape: bf16[8,64], index: 4, kind: input, shape index: {}]   ;;  %s1508_s5 = inlined_call_operand.vmem [shape: bf16[8,64], index: 5, kind: input, shape index: {}]   ;;  %s1509_s6 = inlined_call_operand.vmem [shape: bf16[8,64], index: 6, kind: input, shape index: {}]   ;;  %s1510_s7 = inlined_call_operand.vmem [shape: bf16[64,64], index: 7, kind: input, shape index: {}]   ;;  %s1511_s8 = inlined_call_operand.vmem [shape: bf16[64,128], index: 8, kind: input, shape index: {}]   ;;  %s1512_s9 = inlined_call_operand.vmem [shape: f32[6,64], index: 9, kind: input, shape index: {}]   ;;  %s1513_s10 = inlined_call_operand.vmem [shape: f32[1,128], index: 10, kind: input, shape index: {}]   ;;  %s1514_s11 = inlined_call_operand.hbm [shape: f32[64,64], index: 11, kind: input, shape index: {}]   ;;  %s1515_s12 = inlined_call_operand.hbm [shape: f32[16,128], index: 12, kind: output, shape index: {}]  }
   0x1   :  { %18 = vsyncpa [#allocation4], 0  ;;  %s1398_s21 = smov 0  }
   0x2 LB: > { %s352_s24 = sshll.u32 %s1514_s11, 4  ;;  %s1407_s25 = sadd.s32 4294967295, %s1324_s21   ;;  %s1324_s21 = sphi %s1398_s21, %s24_s21   ;;  %s353_s24 = int_to_ptr.hbm [resolvable:$true] %s352_s24 }
   0x3   : > { %p1104_p0 = scmp.ge.s32.totalorder %s1324_s21, 1  ;;  %p317_p1 = scmp.lt.s32.totalorder %s1324_s21, 4 }
   0x4   : > { %p1105_p2 = scmp.ne.s32.totalorder %s1407_s25, 0  ;;  %p1207_p3 = scmp.eq.s32.totalorder %s1407_s25, 0 }
   0x5   : > { %p318_p4 = pnand %p1104_p0, %p317_p1  ;;  %s1326_s26 = smov [#allocation2]  }
   0x6   : > { %s354_s27 = sshll.u32 %s1326_s26, 4  ;;  %s1327_s28 = smov 128   ;;  %s355_s27 = int_to_ptr.vmem [resolvable:$true] %s354_s27 }
   0x7   : > { %p1203_p5 = pneg %p318_p4  ;;  %s1328_s29 = smov 8  }
   0x8   : > { %397 = sbr.rel (%p318_p4) target bundleno = 1381 (0x565), region = 68 }
   0x9   : > { %p1204_p6 = pnand %p1207_p3, %p1203_p5 }
   0xb   : > { %1206 = dma.hbm_to_vmem [thread:$0]  (!%p1204_p6), %s353_s24, 1024, %s355_s27, [#allocation3], %s1327_s28, %s1327_s28, %s1328_s29  }
   0xd   : > { %1315 = dma.done.wait (%p1207_p3), [#allocation3], 1024  }
   0xe   : > { %1317 = vsyncadd (%p1207_p3), [#allocation3], 4294966272  ;;  %s1109_s30 = sshll.u32 %s1407_s25, 1 }
   0xf   : > { %p446_p7 = scmp.lt.s32.totalorder %s1109_s30, 5 }
  0x10   : > { %467 = sbr.rel (%p1105_p2) target bundleno = 24 (0x18), region = 76 }
  0x11   : > { %s1517_s30 = smov (!%p446_p7, %s1109_s30), 5 }
  0x12   : > { %s1414_s13 = sshll.u32 %s1517_s30, 2 }
  0x13   : > { %s449_s16 = scalar_lea.vmem %s1504_s1, %s1414_s13  ;;  %s455_s19 = scalar_lea.vmem %s1505_s2, %s1414_s13 }
  0x14   : > { %s461_s23 = scalar_lea.vmem %s1506_s3, %s1414_s13 }
  0x15   : > { %v1329_v0 = vmov 0.0  }
  0x16   : > { %468 = vst [vmem:[#allocation5] sm:$0xff] %v1329_v0 }
  0x17   : > { %469 = vst [vmem:[#allocation5 + $0x8] sm:$0xff] %v1329_v0 }
  0x18 PF: > { %v474_v1 = vld [vmem:[%s1503_s0] sm:$0xff]  ;;  %v475_v2 = vld [vmem:[%s1503_s0 + $0x8] sm:$0xff]  ;;  %vm482_vm0 = vcmask 130048   ;;  %vm539_vm1 = vcmask 1043456   ;;  %vm535_vm2 = vcmask 64512   ;;  %v532_v13 = vld [vmem:[#allocation2 + $0x38] sm:$0xff] }
  0x19   : > { %v1184_v3 = vld [vmem:[%s455_s19] sm:$0xff]  ;;  %v476_v4 = vpack.c.bf16 %v475_v2, %v474_v1  ;;  %v531_v20 = vld [vmem:[#allocation2 + $0x30] sm:$0xff]  ;;  %v530_v21 = vld [vmem:[#allocation2 + $0x28] sm:$0xff]  ;;  %vm610_vm3 = vcmask 523264   ;;  %s1330_s22 = smov [#allocation5]   ;;  %s1024_s27 = sshll.u32 %s1515_s12, 4  ;;  %s1025_s27 = int_to_ptr.hbm [resolvable:$true] %s1024_s27 }
  0x1a   : > { %v1185_v5 = vld [vmem:[%s461_s23] sm:$0xff]  ;;  %980 = vxpose.xlu0.c.b16.start.end [1/1] (short) (narrow) %v1184_v3, 16  ;;  %v528_v23 = vld [vmem:[#allocation2 + $0x18] sm:$0xff]  ;;  %v527_v24 = vld [vmem:[#allocation2 + $0x10] sm:$0xff]  ;;  %s1022_s23 = sshll.u32 %s1330_s22, 4  ;;  %p1209_p8 = scmp.eq.s32.totalorder %s1407_s25, 2  ;;  %s1023_s23 = int_to_ptr.vmem [resolvable:$true] %s1022_s23 }
  0x1b   : > { %493 = vmatpush.bf16.msra.mxu0 %v476_v4  ;;  %516 = vmatpush.bf16.msra.mxu1 %v476_v4  ;;  %v534_v6 = vld [vmem:[%s1508_s5] sm:$0xf]  ;;  %v526_v25 = vld [vmem:[#allocation2 + $0x8] sm:$0xff]  ;;  %v1190_v47 = vld [vmem:[%s1510_s7 + $0x18] sm:$0xff]  ;;  %s1331_s28 = smov 128   ;;  %s1332_s29 = smov 8  }
  0x1c   : > { %v533_v7 = vld [vmem:[%s1507_s4] sm:$0xf]  ;;  %v541_v8 = vsel %vm539_vm1, %v534_v6, 0  ;;  %v1189_v50 = vld [vmem:[%s1510_s7 + $0x10] sm:$0xff]  ;;  %v1188_v51 = vld [vmem:[%s1510_s7 + $0x8] sm:$0xff] }
  0x1d   : > { %v561_v9 = vsel %vm539_vm1, %v533_v7, 0  ;;  %v579_v10 = vld [vmem:[%s1509_s6] sm:$0xf]  ;;  %550 = vmatpush.bf16.msra.mxu2 %v541_v8 }
  0x1e   : > { %1120 = vmatmul.msk.bf16.vlgmr.msra.gmra.mxu0 %vm482_vm0, %v1184_v3  ;;  %1125 = vmatmul.msk.bf16.vlgmr.msra.gmra.mxu1 %vm482_vm0, %v1185_v5  ;;  %v589_v11 = vsel %vm539_vm1, %v579_v10, 0  ;;  %v1186_v12 = vld [vmem:[%s449_s16] sm:$0xff] }
  0x1f   : > { %570 = vmatpush.bf16.msra.mxu3 %v561_v9  ;;  %598 = vmatpush.bf16.msrb.mxu0 %v589_v11  ;;  %v529_v22 = vld [vmem:[#allocation2 + $0x20] sm:$0xff] }
  0x20   : > { %625 = vmatpush.msrb.mxu1 %v532_v13  ;;  %v525_v26 = vld [vmem:[#allocation2] sm:$0xff] }
  0x21   : > { %658 = vmatpush.msrb.mxu2 %v532_v13  ;;  %v1450_v27 = vld [vmem:[%s1512_s9] sm:$0x3f] }
  0x22   : > { %626 = vmatpush.msrb.mxu1 %v531_v20  ;;  %v607_v32 = vperm.slane %v1450_v27, 0  ;;  %v1187_v55 = vld [vmem:[%s1510_s7] sm:$0xff]  ;;  %v695_v63 = vperm.slane %v1450_v27, 1  ;;  %v698_v3 = vperm.slane %v1450_v27, 2 }
  0x23   : > { %806 = vmatpush.msra.mxu0 %v532_v13  ;;  %659 = vmatpush.msrb.mxu2 %v531_v20 }
  0x24   : > { %627 = vmatpush.msrb.mxu1 %v530_v21  ;;  %782 = vmatpush.bf16.msrb.mxu3 %v1190_v47 }
  0x25   : > { %807 = vmatpush.msra.mxu0 %v531_v20  ;;  %660 = vmatpush.msrb.mxu2 %v530_v21 }
  0x26   : > { %628 = vmatpush.msrb.mxu1 %v529_v22 }
  0x27   : > { %808 = vmatpush.msra.mxu0 %v530_v21  ;;  %661 = vmatpush.msrb.mxu2 %v529_v22 }
  0x28   : > { %629 = vmatpush.msrb.mxu1 %v528_v23  ;;  %783 = vmatpush.bf16.msrb.mxu3 %v1189_v50 }
  0x29   : > { %809 = vmatpush.msra.mxu0 %v529_v22  ;;  %662 = vmatpush.msrb.mxu2 %v528_v23 }
  0x2a   : > { %630 = vmatpush.msrb.mxu1 %v527_v24 }
  0x2b   : > { %810 = vmatpush.msra.mxu0 %v528_v23  ;;  %663 = vmatpush.msrb.mxu2 %v527_v24 }
  0x2c   : > { %631 = vmatpush.msrb.mxu1 %v526_v25  ;;  %784 = vmatpush.bf16.msrb.mxu3 %v1188_v51 }
  0x2d   : > { %811 = vmatpush.msra.mxu0 %v527_v24  ;;  %664 = vmatpush.msrb.mxu2 %v526_v25 }
  0x2e   : > { %1132 = vmatmul.msk.bf16.vlgmr.msrb.gmra.mxu0 %vm535_vm2, %v1186_v12  ;;  %632 = vmatpush.msrb.mxu1 %v525_v26 }
  0x2f   : > { %812 = vmatpush.msra.mxu0 %v526_v25  ;;  %665 = vmatpush.msrb.mxu2 %v525_v26 }
  0x30   : > { %839 = vmatpush.msra.mxu1 %v532_v13  ;;  %785 = vmatpush.bf16.msrb.mxu3 %v1187_v55 }
  0x31   : > { %813 = vmatpush.msra.mxu0 %v525_v26 }
  0x32   : > { %840 = vmatpush.msra.mxu1 %v531_v20 }
  0x34   : > { %841 = vmatpush.msra.mxu1 %v530_v21 }
  0x36   : > { %842 = vmatpush.msra.mxu1 %v529_v22 }
  0x38   : > { %843 = vmatpush.msra.mxu1 %v528_v23 }
  0x3a   : > { %844 = vmatpush.msra.mxu1 %v527_v24 }
  0x3c   : > { %845 = vmatpush.msra.mxu1 %v526_v25 }
  0x3e   : > { %846 = vmatpush.msra.mxu1 %v525_v26 }
  0x9b   : > { %v495_v14 = vpop.f32.mrf.mxu0  ;;  %v518_v15 = vpop.f32.mrf.mxu1 }
  0xa3   : > { %v497_v16 = vpop.f32.mrf.mxu0  ;;  %v520_v17 = vpop.f32.mrf.mxu1 }
  0xa4   : > { %v500_v18 = vpack.c.bf16 %v497_v16, %v495_v14  ;;  %v523_v19 = vpack.c.bf16 %v520_v17, %v518_v15 }
  0xa6   : > { %1126 = vmatmul.msk.bf16.vlgmr.msra.gmra.mxu2 %vm535_vm2, %v523_v19  ;;  %1127 = vmatmul.msk.bf16.vlgmr.msra.gmra.mxu3 %vm535_vm2, %v500_v18 }
  0xab   : > { %v600_v28 = vpop.f32.mrf.mxu0 }
  0xb3   : > { %v602_v38 = vpop.f32.mrf.mxu0 }
 0x129   : > { %v552_v29 = vpop.f32.mrf.mxu2  ;;  %v572_v30 = vpop.f32.mrf.mxu3 }
 0x12a   : > { %v573_v31 = vadd.f32 %v572_v30, %v552_v29 }
 0x12c   : > { %v605_v33 = vadd.f32 %v600_v28, %v573_v31 }
 0x12e   : > { %v608_v34 = vadd.f32 %v607_v32, %v605_v33 }
 0x130   : > { %1133 = vmatmul.msk.f32.vlgmr.msrb.gmra.mxu1 %vm610_vm3, %v608_v34 }
 0x131   : > { %v554_v35 = vpop.f32.mrf.mxu2  ;;  %v574_v36 = vpop.f32.mrf.mxu3 }
 0x132   : > { %v575_v37 = vadd.f32 %v574_v36, %v554_v35 }
 0x134   : > { %v606_v39 = vadd.f32 %v602_v38, %v575_v37 }
 0x136   : > { %v609_v40 = vadd.f32 %v607_v32, %v606_v39 }
 0x138   : > { %1134 = vmatmul.msk.f32.gmra.mxu1 %vm610_vm3, %v609_v40 }
 0x1ad   : > { %v634_v41 = vpop.f32.mrf.mxu1 }
 0x1ae   : > { %v640_v42 = vsub.f32 %v608_v34, %v634_v41 }
 0x1b0   : > { %v642_v43 = vmul.f32 %v640_v42, %v640_v42 }
 0x1b2   : > { %1135 = vmatmul.msk.f32.vlgmr.msrb.gmra.mxu2 %vm610_vm3, %v642_v43  ;;  %v750_v43 = vperm.slane %v1450_v27, 3 }
 0x1b5   : > { %v637_v44 = vpop.f32.mrf.mxu1 }
 0x1b6   : > { %v641_v45 = vsub.f32 %v609_v40, %v637_v44 }
 0x1b8   : > { %v643_v46 = vmul.f32 %v641_v45, %v641_v45 }
 0x1ba   : > { %1136 = vmatmul.msk.f32.gmra.mxu2 %vm610_vm3, %v643_v46 }
 0x235   : > { %v667_v48 = vpop.f32.mrf.mxu2 }
 0x236   : > { %v668_v49 = vadd.f32 1e-05, %v667_v48 }
 0x238   : > { %1228 = vrsqrt.f32 %v668_v49  ;;  %vm679_vm5 = vweird.f32 %v668_v49 }
 0x23d   : > { %v670_v52 = vpop.f32.mrf.mxu2 }
 0x23e   : > { %v1229_v53 = vpop.eup %1228  ;;  %v671_v54 = vadd.f32 1e-05, %v670_v52 }
 0x23f   : > { %v674_v56 = vmul.f32 %v1229_v53, %v668_v49  ;;  %vm680_vm4 = vweird.f32 %v1229_v53 }
 0x240   : > { %1230 = vrsqrt.f32 %v671_v54  ;;  %vm681_vm6 = vmor %vm679_vm5, %vm680_vm4  ;;  %vm689_vm8 = vweird.f32 %v671_v54 }
 0x241   : > { %v675_v57 = vmul.f32 %v1229_v53, %v674_v56 }
 0x243   : > { %v676_v58 = vmul.f32 0.5, %v675_v57 }
 0x245   : > { %v677_v59 = vsub.f32 1.5, %v676_v58 }
 0x246   : > { %v1231_v60 = vpop.eup %1230 }
 0x247   : > { %v678_v61 = vmul.f32 %v1229_v53, %v677_v59  ;;  %v684_v62 = vmul.f32 %v1231_v60, %v671_v54  ;;  %vm690_vm7 = vweird.f32 %v1231_v60 }
 0x248   : > { %vm691_vm9 = vmor %vm689_vm8, %vm690_vm7 }
 0x249   : > { %v682_v0 = vsel %vm681_vm6, %v1229_v53, %v678_v61  ;;  %v685_v1 = vmul.f32 %v1231_v60, %v684_v62  ;;  %v1194_v62 = vld [vmem:[%s1511_s8 + $0x18] sm:$0xff] }
 0x24a   : > { %v693_v2 = vmul.f32 %v682_v0, %v640_v42  ;;  %966 = vmatpush.bf16.msra.mxu2 %v1194_v62  ;;  %v1193_v0 = vld [vmem:[%s1511_s8 + $0x10] sm:$0xff] }
 0x24b   : > { %v686_v4 = vmul.f32 0.5, %v685_v1 }
 0x24c   : > { %v696_v5 = vmul.f32 %v695_v63, %v693_v2 }
 0x24d   : > { %v687_v6 = vsub.f32 1.5, %v686_v4  ;;  %v876_v4 = vperm.slane %v1450_v27, 4 }
 0x24e   : > { %v699_v7 = vadd.f32 %v698_v3, %v696_v5  ;;  %967 = vmatpush.bf16.msra.mxu2 %v1193_v0 }
 0x24f   : > { %v688_v8 = vmul.f32 %v1231_v60, %v687_v6 }
 0x250   : > { %v1137_v9 = vmul.f32 -1.442695, %v699_v7 }
 0x251   : > { %v692_v10 = vsel %vm691_vm9, %v1231_v60, %v688_v8 }
 0x252   : > { %v694_v11 = vmul.f32 %v692_v10, %v641_v45  ;;  %1232 = vpow2.f32 %v1137_v9  ;;  %v879_v9 = vperm.slane %v1450_v27, 5 }
 0x254   : > { %v697_v12 = vmul.f32 %v695_v63, %v694_v11 }
 0x256   : > { %v700_v13 = vadd.f32 %v698_v3, %v697_v12 }
 0x258   : > { %v1233_v14 = vpop.eup %1232  ;;  %v1138_v15 = vmul.f32 -1.442695, %v700_v13 }
 0x259   : > { %v707_v16 = vadd.f32 1.0, %v1233_v14 }
 0x25a   : > { %1234 = vpow2.f32 %v1138_v15 }
 0x25b   : > { %1236 = vrcp.f32 %v707_v16  ;;  %v720_v26 = vand.u32 2147483648, %v707_v16  ;;  %vm714_vm11 = vweird.f32 %v707_v16  ;;  %v718_v28 = vand.u32 2147483647, %v707_v16 }
 0x25d   : > { %v721_v34 = vor.u32 1.1754944e-38, %v720_v26  ;;  %vm719_vm14 = vcmp.eq.f32.partialorder %v718_v28, 8.507059e+37 }
 0x260   : > { %v1235_v17 = vpop.eup %1234 }
 0x261   : > { %v1237_v18 = vpop.eup %1236  ;;  %v708_v19 = vadd.f32 1.0, %v1235_v17 }
 0x262   : > { %v710_v20 = vmul.f32 %v1237_v18, %v707_v16  ;;  %vm715_vm10 = vweird.f32 %v1237_v18 }
 0x263   : > { %1238 = vrcp.f32 %v708_v19  ;;  %vm716_vm12 = vmor %vm714_vm11, %vm715_vm10  ;;  %v735_v30 = vand.u32 2147483648, %v708_v19  ;;  %v733_v33 = vand.u32 2147483647, %v708_v19  ;;  %vm729_vm15 = vweird.f32 %v708_v19 }
 0x264   : > { %v711_v21 = vsub.f32 1.0, %v710_v20 }
 0x265   : > { %v736_v37 = vor.u32 1.1754944e-38, %v735_v30  ;;  %vm734_vm2 = vcmp.eq.f32.partialorder %v733_v33, 8.507059e+37 }
 0x266   : > { %v712_v22 = vmul.f32 %v1237_v18, %v711_v21 }
 0x268   : > { %v713_v24 = vadd.f32 %v1237_v18, %v712_v22 }
 0x269   : > { %v1239_v23 = vpop.eup %1238 }
 0x26a   : > { %v725_v25 = vmul.f32 %v1239_v23, %v708_v19  ;;  %v717_v31 = vsel %vm716_vm12, %v1237_v18, %v713_v24  ;;  %vm730_vm13 = vweird.f32 %v1239_v23 }
 0x26b   : > { %v722_v36 = vsel %vm719_vm14, %v721_v34, %v717_v31  ;;  %vm731_vm1 = vmor %vm729_vm15, %vm730_vm13 }
 0x26c   : > { %v726_v29 = vsub.f32 1.0, %v725_v25  ;;  %v739_v40 = vmul.f32 %v722_v36, %v699_v7  ;;  %v1192_v7 = vld [vmem:[%s1511_s8 + $0x8] sm:$0xff] }
 0x26d   : > { %968 = vmatpush.bf16.msra.mxu2 %v1192_v7 }
 0x26e   : > { %v727_v32 = vmul.f32 %v1239_v23, %v726_v29 }
 0x270   : > { %v728_v35 = vadd.f32 %v1239_v23, %v727_v32 }
 0x272   : > { %v732_v38 = vsel %vm731_vm1, %v1239_v23, %v728_v35 }
 0x273   : > { %v737_v39 = vsel %vm734_vm2, %v736_v37, %v732_v38 }
 0x274   : > { %v740_v41 = vmul.f32 %v737_v39, %v700_v13  ;;  %v1191_v13 = vld [vmem:[%s1511_s8] sm:$0xff] }
 0x275   : > { %969 = vmatpush.bf16.msra.mxu2 %v1191_v13 }
 0x276   : > { %v741_v42 = vpack.c.bf16 %v740_v41, %v739_v40 }
 0x278   : > { %1155 = vmatmul.msk.bf16.vlgmr.msrb.gmra.mxu3 %vm610_vm3, %v741_v42 }
 0x2fb   : > { %v787_v44 = vpop.f32.mrf.mxu3 }
 0x2fc   : > { %v788_v45 = vadd.f32 %v787_v44, %v750_v43 }
 0x2fe   : > { %1156 = vmatmul.msk.f32.vlgmr.msra.gmra.mxu0 %vm610_vm3, %v788_v45 }
 0x303   : > { %v789_v46 = vpop.f32.mrf.mxu3 }
 0x304   : > { %v790_v47 = vadd.f32 %v789_v46, %v750_v43 }
 0x306   : > { %1157 = vmatmul.msk.f32.gmra.mxu0 %vm610_vm3, %v790_v47 }
 0x37b   : > { %v815_v48 = vpop.f32.mrf.mxu0 }
 0x37c   : > { %v821_v49 = vsub.f32 %v788_v45, %v815_v48 }
 0x37e   : > { %v823_v50 = vmul.f32 %v821_v49, %v821_v49 }
 0x380   : > { %1158 = vmatmul.msk.f32.vlgmr.msra.gmra.mxu1 %vm610_vm3, %v823_v50  ;;  %v1227_v50 = vld [vmem:[%s1513_s10] ss:$0 sm:$0xff] }
 0x383   : > { %v818_v51 = vpop.f32.mrf.mxu0 }
 0x384   : > { %v822_v52 = vsub.f32 %v790_v47, %v818_v51 }
 0x386   : > { %v824_v53 = vmul.f32 %v822_v52, %v822_v52 }
 0x388   : > { %1159 = vmatmul.msk.f32.gmra.mxu1 %vm610_vm3, %v824_v53 }
 0x3fd   : > { %v848_v54 = vpop.f32.mrf.mxu1 }
 0x3fe   : > { %v849_v55 = vadd.f32 1e-05, %v848_v54 }
 0x400   : > { %1240 = vrsqrt.f32 %v849_v55  ;;  %vm860_vm5 = vweird.f32 %v849_v55 }
 0x405   : > { %v851_v56 = vpop.f32.mrf.mxu1 }
 0x406   : > { %v1241_v57 = vpop.eup %1240  ;;  %v852_v58 = vadd.f32 1e-05, %v851_v56  ;;  %v976_v56 = vld [vmem:[#allocation5] sm:$0xff] }
 0x407   : > { %v855_v59 = vmul.f32 %v1241_v57, %v849_v55  ;;  %vm861_vm4 = vweird.f32 %v1241_v57  ;;  %v988_v55 = vpop.trf.xlu0 }
 0x408   : > { %1242 = vrsqrt.f32 %v852_v58  ;;  %vm862_vm6 = vmor %vm860_vm5, %vm861_vm4  ;;  %vm870_vm8 = vweird.f32 %v852_v58 }
 0x409   : > { %v856_v60 = vmul.f32 %v1241_v57, %v855_v59  ;;  %v977_v59 = vld [vmem:[#allocation5 + $0x8] sm:$0xff] }
 0x40b   : > { %v857_v61 = vmul.f32 0.5, %v856_v60 }
 0x40d   : > { %v858_v63 = vsub.f32 1.5, %v857_v61 }
 0x40e   : > { %v1243_v1 = vpop.eup %1242 }
 0x40f   : > { %v859_v2 = vmul.f32 %v1241_v57, %v858_v63  ;;  %v865_v3 = vmul.f32 %v1243_v1, %v852_v58  ;;  %vm871_vm7 = vweird.f32 %v1243_v1 }
 0x410   : > { %vm872_vm9 = vmor %vm870_vm8, %vm871_vm7 }
 0x411   : > { %v863_v5 = vsel %vm862_vm6, %v1241_v57, %v859_v2  ;;  %v866_v6 = vmul.f32 %v1243_v1, %v865_v3 }
 0x412   : > { %v874_v8 = vmul.f32 %v863_v5, %v821_v49 }
 0x413   : > { %v867_v10 = vmul.f32 0.5, %v866_v6 }
 0x414   : > { %v877_v11 = vmul.f32 %v876_v4, %v874_v8 }
 0x415   : > { %v868_v12 = vsub.f32 1.5, %v867_v10 }
 0x416   : > { %v880_v14 = vadd.f32 %v879_v9, %v877_v11 }
 0x417   : > { %v869_v15 = vmul.f32 %v1243_v1, %v868_v12 }
 0x418   : > { %v1160_v16 = vmul.f32 -1.442695, %v880_v14 }
 0x419   : > { %v873_v17 = vsel %vm872_vm9, %v1243_v1, %v869_v15 }
 0x41a   : > { %1244 = vpow2.f32 %v1160_v16  ;;  %v875_v18 = vmul.f32 %v873_v17, %v822_v52 }
 0x41c   : > { %v878_v19 = vmul.f32 %v876_v4, %v875_v18 }
 0x41e   : > { %v881_v27 = vadd.f32 %v879_v9, %v878_v19 }
 0x420   : > { %v1245_v20 = vpop.eup %1244  ;;  %v1161_v21 = vmul.f32 -1.442695, %v881_v27 }
 0x421   : > { %v888_v22 = vadd.f32 1.0, %v1245_v20 }
 0x422   : > { %1246 = vpow2.f32 %v1161_v21 }
 0x423   : > { %1248 = vrcp.f32 %v888_v22  ;;  %v901_v33 = vand.u32 2147483648, %v888_v22  ;;  %vm895_vm11 = vweird.f32 %v888_v22  ;;  %v899_v34 = vand.u32 2147483647, %v888_v22 }
 0x425   : > { %v902_v40 = vor.u32 1.1754944e-38, %v901_v33  ;;  %vm900_vm14 = vcmp.eq.f32.partialorder %v899_v34, 8.507059e+37 }
 0x428   : > { %v1247_v23 = vpop.eup %1246 }
 0x429   : > { %v1249_v24 = vpop.eup %1248  ;;  %v889_v25 = vadd.f32 1.0, %v1247_v23 }
 0x42a   : > { %v891_v26 = vmul.f32 %v1249_v24, %v888_v22  ;;  %vm896_vm10 = vweird.f32 %v1249_v24 }
 0x42b   : > { %1250 = vrcp.f32 %v889_v25  ;;  %vm897_vm12 = vmor %vm895_vm11, %vm896_vm10  ;;  %v916_v36 = vand.u32 2147483648, %v889_v25  ;;  %v914_v39 = vand.u32 2147483647, %v889_v25  ;;  %vm910_vm15 = vweird.f32 %v889_v25 }
 0x42c   : > { %v892_v28 = vsub.f32 1.0, %v891_v26 }
 0x42d   : > { %v917_v43 = vor.u32 1.1754944e-38, %v916_v36  ;;  %vm915_vm2 = vcmp.eq.f32.partialorder %v914_v39, 8.507059e+37 }
 0x42e   : > { %v893_v29 = vmul.f32 %v1249_v24, %v892_v28 }
 0x430   : > { %v894_v31 = vadd.f32 %v1249_v24, %v893_v29 }
 0x431   : > { %v1251_v30 = vpop.eup %1250 }
 0x432   : > { %v906_v32 = vmul.f32 %v1251_v30, %v889_v25  ;;  %v898_v37 = vsel %vm897_vm12, %v1249_v24, %v894_v31  ;;  %vm911_vm13 = vweird.f32 %v1251_v30 }
 0x433   : > { %v903_v42 = vsel %vm900_vm14, %v902_v40, %v898_v37  ;;  %vm912_vm1 = vmor %vm910_vm15, %vm911_vm13 }
 0x434   : > { %v907_v35 = vsub.f32 1.0, %v906_v32  ;;  %v920_v46 = vmul.f32 %v903_v42, %v880_v14 }
 0x436   : > { %v908_v38 = vmul.f32 %v1251_v30, %v907_v35 }
 0x438   : > { %v909_v41 = vadd.f32 %v1251_v30, %v908_v38 }
 0x43a   : > { %v913_v44 = vsel %vm912_vm1, %v1251_v30, %v909_v41 }
 0x43b   : > { %v918_v45 = vsel %vm915_vm2, %v917_v43, %v913_v44 }
 0x43c   : > { %v921_v47 = vmul.f32 %v918_v45, %v881_v27 }
 0x43e   : > { %v922_v48 = vpack.c.bf16 %v921_v47, %v920_v46 }
 0x440   : > { %1178 = vmatmul.msk.bf16.vlgmr.msra.gmra.mxu2 %vm610_vm3, %v922_v48 }
 0x4c3   : > { %v971_v49 = vpop.f32.mrf.mxu2 }
 0x4c4   : > { %v972_v52 = vadd.f32 %v1227_v50, %v971_v49 }
 0x4cb   : > { %v973_v51 = vpop.f32.mrf.mxu2 }
 0x4cc   : > { %v974_v53 = vadd.f32 %v1227_v50, %v973_v51 }
 0x4ce   : > { %v978_v54 = vpack.c.bf16 %v974_v53, %v972_v52 }
 0x4d0   : > { %1006 = vmatpush.bf16.msra.mxu3 %v978_v54 }
 0x4d3   : > { %1179 = vmatmul.msk.bf16.vlgmr.msra.gmra.mxu3 %vm482_vm0, %v988_v55 }
 0x556   : > { %v1008_v57 = vpop.f32.mrf.mxu3 }
 0x557   : > { %v1013_v58 = vadd.f32 %v1008_v57, %v976_v56 }
 0x559   : > { %1015 = vst [vmem:[#allocation5] sm:$0xff] %v1013_v58 }
 0x55e   : > { %v1010_v60 = vpop.f32.mrf.mxu3 }
 0x55f   : > { %v1014_v61 = vadd.f32 %v1010_v60, %v977_v59 }
 0x561   : > { %1016 = vst [vmem:[#allocation5 + $0x8] sm:$0xff] %v1014_v61 }
 0x562   : > { %1200 = dma.vmem_to_hbm [thread:$0]  (%p1209_p8), %s1023_s23, 256, %s1025_s27, [#allocation4], %s1331_s28, %s1331_s28, %s1332_s29  }
 0x563   : > { %1319 = dma.done.wait (%p1209_p8), [#allocation4], 256  }
 0x564   : > { %1321 = vsyncadd (%p1209_p8), [#allocation4], 4294967040 }
 0x565 PF: > { %s24_s21 = sadd.s32 1, %s1324_s21  }
 0x566   : > { %p21_p9 = scmp.ge.s32.totalorder %s24_s21, 5  }
 0x568   :  { %23 = sbr.rel (!%p21_p9) target bundleno = 2 (0x2), region = 110 }
 0x56d   :  { %1041 = vsyncpa [#allocation3], 1 }
 0x56e   :  { %1043 = vsyncpa [#allocation3 + $0x1], 1 }
 0x56f   :  { %1044 = vsyncpa [#allocation4], 1 }
 0x570   :  { %1046 = vsyncpa [#allocation4 + $0x1], 1 }

// kernel: tpu_custom_call.1
= control target key start
LH: loop header
LB: loop body
LE: loop exit
PB: predicated region body
PF: predicated region fallthrough
CT: control target
= control target key end

     0   :  { %17 = vsyncpa [#allocation3], 0  ;;  %s1503_s0 = inlined_call_operand.vmem [shape: f32[16,8], index: 0, kind: input, shape index: {}]   ;;  %s1504_s1 = inlined_call_operand.vmem [shape: bf16[48,8], index: 1, kind: input, shape index: {}]   ;;  %s1505_s2 = inlined_call_operand.vmem [shape: bf16[48,16], index: 2, kind: input, shape index: {}]   ;;  %s1506_s3 = inlined_call_operand.vmem [shape: bf16[48,16], index: 3, kind: input, shape index: {}]   ;;  %s1507_s4 = inlined_call_operand.vmem [shape: bf16[8,64], index: 4, kind: input, shape index: {}]   ;;  %s1508_s5 = inlined_call_operand.vmem [shape: bf16[8,64], index: 5, kind: input, shape index: {}]   ;;  %s1509_s6 = inlined_call_operand.vmem [shape: bf16[8,64], index: 6, kind: input, shape index: {}]   ;;  %s1510_s7 = inlined_call_operand.vmem [shape: bf16[64,64], index: 7, kind: input, shape index: {}]   ;;  %s1511_s8 = inlined_call_operand.vmem [shape: bf16[64,128], index: 8, kind: input, shape index: {}]   ;;  %s1512_s9 = inlined_call_operand.vmem [shape: f32[6,64], index: 9, kind: input, shape index: {}]   ;;  %s1513_s10 = inlined_call_operand.vmem [shape: f32[1,128], index: 10, kind: input, shape index: {}]   ;;  %s1514_s11 = inlined_call_operand.hbm [shape: f32[64,64], index: 11, kind: input, shape index: {}]   ;;  %s1515_s12 = inlined_call_operand.hbm [shape: f32[16,128], index: 12, kind: output, shape index: {}]  }
   0x1   :  { %18 = vsyncpa [#allocation4], 0  ;;  %s1398_s21 = smov 0  }
   0x2 LB: > { %s352_s24 = sshll.u32 %s1514_s11, 4  ;;  %s1407_s25 = sadd.s32 4294967295, %s1324_s21   ;;  %s1324_s21 = sphi %s1398_s21, %s24_s21   ;;  %s353_s24 = int_to_ptr.hbm [resolvable:$true] %s352_s24 }
   0x3   : > { %p1104_p0 = scmp.ge.s32.totalorder %s1324_s21, 1  ;;  %p317_p1 = scmp.lt.s32.totalorder %s1324_s21, 4 }
   0x4   : > { %p1105_p2 = scmp.ne.s32.totalorder %s1407_s25, 0  ;;  %p1207_p3 = scmp.eq.s32.totalorder %s1407_s25, 0 }
   0x5   : > { %p318_p4 = pnand %p1104_p0, %p317_p1  ;;  %s1326_s26 = smov [#allocation2]  }
   0x6   : > { %s354_s27 = sshll.u32 %s1326_s26, 4  ;;  %s1327_s28 = smov 128   ;;  %s355_s27 = int_to_ptr.vmem [resolvable:$true] %s354_s27 }
   0x7   : > { %p1203_p5 = pneg %p318_p4  ;;  %s1328_s29 = smov 8  }
   0x8   : > { %397 = sbr.rel (%p318_p4) target bundleno = 1381 (0x565), region = 68 }
   0x9   : > { %p1204_p6 = pnand %p1207_p3, %p1203_p5 }
   0xb   : > { %1206 = dma.hbm_to_vmem [thread:$0]  (!%p1204_p6), %s353_s24, 1024, %s355_s27, [#allocation3], %s1327_s28, %s1327_s28, %s1328_s29  }
   0xd   : > { %1315 = dma.done.wait (%p1207_p3), [#allocation3], 1024  }
   0xe   : > { %1317 = vsyncadd (%p1207_p3), [#allocation3], 4294966272  ;;  %s1109_s30 = sshll.u32 %s1407_s25, 1 }
   0xf   : > { %p446_p7 = scmp.lt.s32.totalorder %s1109_s30, 5 }
  0x10   : > { %467 = sbr.rel (%p1105_p2) target bundleno = 24 (0x18), region = 76 }
  0x11   : > { %s1517_s30 = smov (!%p446_p7, %s1109_s30), 5 }
  0x12   : > { %s1414_s13 = sshll.u32 %s1517_s30, 2 }
  0x13   : > { %s449_s16 = scalar_lea.vmem %s1504_s1, %s1414_s13  ;;  %s455_s19 = scalar_lea.vmem %s1505_s2, %s1414_s13 }
  0x14   : > { %s461_s23 = scalar_lea.vmem %s1506_s3, %s1414_s13 }
  0x15   : > { %v1329_v0 = vmov 0.0  }
  0x16   : > { %468 = vst [vmem:[#allocation5] sm:$0xff] %v1329_v0 }
  0x17   : > { %469 = vst [vmem:[#allocation5 + $0x8] sm:$0xff] %v1329_v0 }
  0x18 PF: > { %v474_v1 = vld [vmem:[%s1503_s0] sm:$0xff]  ;;  %v475_v2 = vld [vmem:[%s1503_s0 + $0x8] sm:$0xff]  ;;  %vm482_vm0 = vcmask 130048   ;;  %vm539_vm1 = vcmask 1043456   ;;  %vm535_vm2 = vcmask 64512   ;;  %v532_v13 = vld [vmem:[#allocation2 + $0x38] sm:$0xff] }
  0x19   : > { %v1184_v3 = vld [vmem:[%s455_s19] sm:$0xff]  ;;  %v476_v4 = vpack.c.bf16 %v475_v2, %v474_v1  ;;  %v531_v20 = vld [vmem:[#allocation2 + $0x30] sm:$0xff]  ;;  %v530_v21 = vld [vmem:[#allocation2 + $0x28] sm:$0xff]  ;;  %vm610_vm3 = vcmask 523264   ;;  %s1330_s22 = smov [#allocation5]   ;;  %s1024_s27 = sshll.u32 %s1515_s12, 4  ;;  %s1025_s27 = int_to_ptr.hbm [resolvable:$true] %s1024_s27 }
  0x1a   : > { %v1185_v5 = vld [vmem:[%s461_s23] sm:$0xff]  ;;  %980 = vxpose.xlu0.c.b16.start.end [1/1] (short) (narrow) %v1184_v3, 16  ;;  %v528_v23 = vld [vmem:[#allocation2 + $0x18] sm:$0xff]  ;;  %v527_v24 = vld [vmem:[#allocation2 + $0x10] sm:$0xff]  ;;  %s1022_s23 = sshll.u32 %s1330_s22, 4  ;;  %p1209_p8 = scmp.eq.s32.totalorder %s1407_s25, 2  ;;  %s1023_s23 = int_to_ptr.vmem [resolvable:$true] %s1022_s23 }
  0x1b   : > { %493 = vmatpush.bf16.msra.mxu0 %v476_v4  ;;  %516 = vmatpush.bf16.msra.mxu1 %v476_v4  ;;  %v534_v6 = vld [vmem:[%s1508_s5] sm:$0xf]  ;;  %v526_v25 = vld [vmem:[#allocation2 + $0x8] sm:$0xff]  ;;  %v1190_v47 = vld [vmem:[%s1510_s7 + $0x18] sm:$0xff]  ;;  %s1331_s28 = smov 128   ;;  %s1332_s29 = smov 8  }
  0x1c   : > { %v533_v7 = vld [vmem:[%s1507_s4] sm:$0xf]  ;;  %v541_v8 = vsel %vm539_vm1, %v534_v6, 0  ;;  %v1189_v50 = vld [vmem:[%s1510_s7 + $0x10] sm:$0xff]  ;;  %v1188_v51 = vld [vmem:[%s1510_s7 + $0x8] sm:$0xff] }
  0x1d   : > { %v561_v9 = vsel %vm539_vm1, %v533_v7, 0  ;;  %v579_v10 = vld [vmem:[%s1509_s6] sm:$0xf]  ;;  %550 = vmatpush.bf16.msra.mxu2 %v541_v8 }
  0x1e   : > { %1120 = vmatmul.msk.bf16.vlgmr.msra.gmra.mxu0 %vm482_vm0, %v1184_v3  ;;  %1125 = vmatmul.msk.bf16.vlgmr.msra.gmra.mxu1 %vm482_vm0, %v1185_v5  ;;  %v589_v11 = vsel %vm539_vm1, %v579_v10, 0  ;;  %v1186_v12 = vld [vmem:[%s449_s16] sm:$0xff] }
  0x1f   : > { %570 = vmatpush.bf16.msra.mxu3 %v561_v9  ;;  %598 = vmatpush.bf16.msrb.mxu0 %v589_v11  ;;  %v529_v22 = vld [vmem:[#allocation2 + $0x20] sm:$0xff] }
  0x20   : > { %625 = vmatpush.msrb.mxu1 %v532_v13  ;;  %v525_v26 = vld [vmem:[#allocation2] sm:$0xff] }
  0x21   : > { %658 = vmatpush.msrb.mxu2 %v532_v13  ;;  %v1450_v27 = vld [vmem:[%s1512_s9] sm:$0x3f] }
  0x22   : > { %626 = vmatpush.msrb.mxu1 %v531_v20  ;;  %v607_v32 = vperm.slane %v1450_v27, 0  ;;  %v1187_v55 = vld [vmem:[%s1510_s7] sm:$0xff]  ;;  %v695_v63 = vperm.slane %v1450_v27, 1  ;;  %v698_v3 = vperm.slane %v1450_v27, 2 }
  0x23   : > { %806 = vmatpush.msra.mxu0 %v532_v13  ;;  %659 = vmatpush.msrb.mxu2 %v531_v20 }
  0x24   : > { %627 = vmatpush.msrb.mxu1 %v530_v21  ;;  %782 = vmatpush.bf16.msrb.mxu3 %v1190_v47 }
  0x25   : > { %807 = vmatpush.msra.mxu0 %v531_v20  ;;  %660 = vmatpush.msrb.mxu2 %v530_v21 }
  0x26   : > { %628 = vmatpush.msrb.mxu1 %v529_v22 }
  0x27   : > { %808 = vmatpush.msra.mxu0 %v530_v21  ;;  %661 = vmatpush.msrb.mxu2 %v529_v22 }
  0x28   : > { %629 = vmatpush.msrb.mxu1 %v528_v23  ;;  %783 = vmatpush.bf16.msrb.mxu3 %v1189_v50 }
  0x29   : > { %809 = vmatpush.msra.mxu0 %v529_v22  ;;  %662 = vmatpush.msrb.mxu2 %v528_v23 }
  0x2a   : > { %630 = vmatpush.msrb.mxu1 %v527_v24 }
  0x2b   : > { %810 = vmatpush.msra.mxu0 %v528_v23  ;;  %663 = vmatpush.msrb.mxu2 %v527_v24 }
  0x2c   : > { %631 = vmatpush.msrb.mxu1 %v526_v25  ;;  %784 = vmatpush.bf16.msrb.mxu3 %v1188_v51 }
  0x2d   : > { %811 = vmatpush.msra.mxu0 %v527_v24  ;;  %664 = vmatpush.msrb.mxu2 %v526_v25 }
  0x2e   : > { %1132 = vmatmul.msk.bf16.vlgmr.msrb.gmra.mxu0 %vm535_vm2, %v1186_v12  ;;  %632 = vmatpush.msrb.mxu1 %v525_v26 }
  0x2f   : > { %812 = vmatpush.msra.mxu0 %v526_v25  ;;  %665 = vmatpush.msrb.mxu2 %v525_v26 }
  0x30   : > { %839 = vmatpush.msra.mxu1 %v532_v13  ;;  %785 = vmatpush.bf16.msrb.mxu3 %v1187_v55 }
  0x31   : > { %813 = vmatpush.msra.mxu0 %v525_v26 }
  0x32   : > { %840 = vmatpush.msra.mxu1 %v531_v20 }
  0x34   : > { %841 = vmatpush.msra.mxu1 %v530_v21 }
  0x36   : > { %842 = vmatpush.msra.mxu1 %v529_v22 }
  0x38   : > { %843 = vmatpush.msra.mxu1 %v528_v23 }
  0x3a   : > { %844 = vmatpush.msra.mxu1 %v527_v24 }
  0x3c   : > { %845 = vmatpush.msra.mxu1 %v526_v25 }
  0x3e   : > { %846 = vmatpush.msra.mxu1 %v525_v26 }
  0x9b   : > { %v495_v14 = vpop.f32.mrf.mxu0  ;;  %v518_v15 = vpop.f32.mrf.mxu1 }
  0xa3   : > { %v497_v16 = vpop.f32.mrf.mxu0  ;;  %v520_v17 = vpop.f32.mrf.mxu1 }
  0xa4   : > { %v500_v18 = vpack.c.bf16 %v497_v16, %v495_v14  ;;  %v523_v19 = vpack.c.bf16 %v520_v17, %v518_v15 }
  0xa6   : > { %1126 = vmatmul.msk.bf16.vlgmr.msra.gmra.mxu2 %vm535_vm2, %v523_v19  ;;  %1127 = vmatmul.msk.bf16.vlgmr.msra.gmra.mxu3 %vm535_vm2, %v500_v18 }
  0xab   : > { %v600_v28 = vpop.f32.mrf.mxu0 }
  0xb3   : > { %v602_v38 = vpop.f32.mrf.mxu0 }
 0x129   : > { %v552_v29 = vpop.f32.mrf.mxu2  ;;  %v572_v30 = vpop.f32.mrf.mxu3 }
 0x12a   : > { %v573_v31 = vadd.f32 %v572_v30, %v552_v29 }
 0x12c   : > { %v605_v33 = vadd.f32 %v600_v28, %v573_v31 }
 0x12e   : > { %v608_v34 = vadd.f32 %v607_v32, %v605_v33 }
 0x130   : > { %1133 = vmatmul.msk.f32.vlgmr.msrb.gmra.mxu1 %vm610_vm3, %v608_v34 }
 0x131   : > { %v554_v35 = vpop.f32.mrf.mxu2  ;;  %v574_v36 = vpop.f32.mrf.mxu3 }
 0x132   : > { %v575_v37 = vadd.f32 %v574_v36, %v554_v35 }
 0x134   : > { %v606_v39 = vadd.f32 %v602_v38, %v575_v37 }
 0x136   : > { %v609_v40 = vadd.f32 %v607_v32, %v606_v39 }
 0x138   : > { %1134 = vmatmul.msk.f32.gmra.mxu1 %vm610_vm3, %v609_v40 }
 0x1ad   : > { %v634_v41 = vpop.f32.mrf.mxu1 }
 0x1ae   : > { %v640_v42 = vsub.f32 %v608_v34, %v634_v41 }
 0x1b0   : > { %v642_v43 = vmul.f32 %v640_v42, %v640_v42 }
 0x1b2   : > { %1135 = vmatmul.msk.f32.vlgmr.msrb.gmra.mxu2 %vm610_vm3, %v642_v43  ;;  %v750_v43 = vperm.slane %v1450_v27, 3 }
 0x1b5   : > { %v637_v44 = vpop.f32.mrf.mxu1 }
 0x1b6   : > { %v641_v45 = vsub.f32 %v609_v40, %v637_v44 }
 0x1b8   : > { %v643_v46 = vmul.f32 %v641_v45, %v641_v45 }
 0x1ba   : > { %1136 = vmatmul.msk.f32.gmra.mxu2 %vm610_vm3, %v643_v46 }
 0x235   : > { %v667_v48 = vpop.f32.mrf.mxu2 }
 0x236   : > { %v668_v49 = vadd.f32 1e-05, %v667_v48 }
 0x238   : > { %1228 = vrsqrt.f32 %v668_v49  ;;  %vm679_vm5 = vweird.f32 %v668_v49 }
 0x23d   : > { %v670_v52 = vpop.f32.mrf.mxu2 }
 0x23e   : > { %v1229_v53 = vpop.eup %1228  ;;  %v671_v54 = vadd.f32 1e-05, %v670_v52 }
 0x23f   : > { %v674_v56 = vmul.f32 %v1229_v53, %v668_v49  ;;  %vm680_vm4 = vweird.f32 %v1229_v53 }
 0x240   : > { %1230 = vrsqrt.f32 %v671_v54  ;;  %vm681_vm6 = vmor %vm679_vm5, %vm680_vm4  ;;  %vm689_vm8 = vweird.f32 %v671_v54 }
 0x241   : > { %v675_v57 = vmul.f32 %v1229_v53, %v674_v56 }
 0x243   : > { %v676_v58 = vmul.f32 0.5, %v675_v57 }
 0x245   : > { %v677_v59 = vsub.f32 1.5, %v676_v58 }
 0x246   : > { %v1231_v60 = vpop.eup %1230 }
 0x247   : > { %v678_v61 = vmul.f32 %v1229_v53, %v677_v59  ;;  %v684_v62 = vmul.f32 %v1231_v60, %v671_v54  ;;  %vm690_vm7 = vweird.f32 %v1231_v60 }
 0x248   : > { %vm691_vm9 = vmor %vm689_vm8, %vm690_vm7 }
 0x249   : > { %v682_v0 = vsel %vm681_vm6, %v1229_v53, %v678_v61  ;;  %v685_v1 = vmul.f32 %v1231_v60, %v684_v62  ;;  %v1194_v62 = vld [vmem:[%s1511_s8 + $0x18] sm:$0xff] }
 0x24a   : > { %v693_v2 = vmul.f32 %v682_v0, %v640_v42  ;;  %966 = vmatpush.bf16.msra.mxu2 %v1194_v62  ;;  %v1193_v0 = vld [vmem:[%s1511_s8 + $0x10] sm:$0xff] }
 0x24b   : > { %v686_v4 = vmul.f32 0.5, %v685_v1 }
 0x24c   : > { %v696_v5 = vmul.f32 %v695_v63, %v693_v2 }
 0x24d   : > { %v687_v6 = vsub.f32 1.5, %v686_v4  ;;  %v876_v4 = vperm.slane %v1450_v27, 4 }
 0x24e   : > { %v699_v7 = vadd.f32 %v698_v3, %v696_v5  ;;  %967 = vmatpush.bf16.msra.mxu2 %v1193_v0 }
 0x24f   : > { %v688_v8 = vmul.f32 %v1231_v60, %v687_v6 }
 0x250   : > { %v1137_v9 = vmul.f32 -1.442695, %v699_v7 }
 0x251   : > { %v692_v10 = vsel %vm691_vm9, %v1231_v60, %v688_v8 }
 0x252   : > { %v694_v11 = vmul.f32 %v692_v10, %v641_v45  ;;  %1232 = vpow2.f32 %v1137_v9  ;;  %v879_v9 = vperm.slane %v1450_v27, 5 }
 0x254   : > { %v697_v12 = vmul.f32 %v695_v63, %v694_v11 }
 0x256   : > { %v700_v13 = vadd.f32 %v698_v3, %v697_v12 }
 0x258   : > { %v1233_v14 = vpop.eup %1232  ;;  %v1138_v15 = vmul.f32 -1.442695, %v700_v13 }
 0x259   : > { %v707_v16 = vadd.f32 1.0, %v1233_v14 }
 0x25a   : > { %1234 = vpow2.f32 %v1138_v15 }
 0x25b   : > { %1236 = vrcp.f32 %v707_v16  ;;  %v720_v26 = vand.u32 2147483648, %v707_v16  ;;  %vm714_vm11 = vweird.f32 %v707_v16  ;;  %v718_v28 = vand.u32 2147483647, %v707_v16 }
 0x25d   : > { %v721_v34 = vor.u32 1.1754944e-38, %v720_v26  ;;  %vm719_vm14 = vcmp.eq.f32.partialorder %v718_v28, 8.507059e+37 }
 0x260   : > { %v1235_v17 = vpop.eup %1234 }
 0x261   : > { %v1237_v18 = vpop.eup %1236  ;;  %v708_v19 = vadd.f32 1.0, %v1235_v17 }
 0x262   : > { %v710_v20 = vmul.f32 %v1237_v18, %v707_v16  ;;  %vm715_vm10 = vweird.f32 %v1237_v18 }
 0x263   : > { %1238 = vrcp.f32 %v708_v19  ;;  %vm716_vm12 = vmor %vm714_vm11, %vm715_vm10  ;;  %v735_v30 = vand.u32 2147483648, %v708_v19  ;;  %v733_v33 = vand.u32 2147483647, %v708_v19  ;;  %vm729_vm15 = vweird.f32 %v708_v19 }
 0x264   : > { %v711_v21 = vsub.f32 1.0, %v710_v20 }
 0x265   : > { %v736_v37 = vor.u32 1.1754944e-38, %v735_v30  ;;  %vm734_vm2 = vcmp.eq.f32.partialorder %v733_v33, 8.507059e+37 }
 0x266   : > { %v712_v22 = vmul.f32 %v1237_v18, %v711_v21 }
 0x268   : > { %v713_v24 = vadd.f32 %v1237_v18, %v712_v22 }
 0x269   : > { %v1239_v23 = vpop.eup %1238 }
 0x26a   : > { %v725_v25 = vmul.f32 %v1239_v23, %v708_v19  ;;  %v717_v31 = vsel %vm716_vm12, %v1237_v18, %v713_v24  ;;  %vm730_vm13 = vweird.f32 %v1239_v23 }
 0x26b   : > { %v722_v36 = vsel %vm719_vm14, %v721_v34, %v717_v31  ;;  %vm731_vm1 = vmor %vm729_vm15, %vm730_vm13 }
 0x26c   : > { %v726_v29 = vsub.f32 1.0, %v725_v25  ;;  %v739_v40 = vmul.f32 %v722_v36, %v699_v7  ;;  %v1192_v7 = vld [vmem:[%s1511_s8 + $0x8] sm:$0xff] }
 0x26d   : > { %968 = vmatpush.bf16.msra.mxu2 %v1192_v7 }
 0x26e   : > { %v727_v32 = vmul.f32 %v1239_v23, %v726_v29 }
 0x270   : > { %v728_v35 = vadd.f32 %v1239_v23, %v727_v32 }
 0x272   : > { %v732_v38 = vsel %vm731_vm1, %v1239_v23, %v728_v35 }
 0x273   : > { %v737_v39 = vsel %vm734_vm2, %v736_v37, %v732_v38 }
 0x274   : > { %v740_v41 = vmul.f32 %v737_v39, %v700_v13  ;;  %v1191_v13 = vld [vmem:[%s1511_s8] sm:$0xff] }
 0x275   : > { %969 = vmatpush.bf16.msra.mxu2 %v1191_v13 }
 0x276   : > { %v741_v42 = vpack.c.bf16 %v740_v41, %v739_v40 }
 0x278   : > { %1155 = vmatmul.msk.bf16.vlgmr.msrb.gmra.mxu3 %vm610_vm3, %v741_v42 }
 0x2fb   : > { %v787_v44 = vpop.f32.mrf.mxu3 }
 0x2fc   : > { %v788_v45 = vadd.f32 %v787_v44, %v750_v43 }
 0x2fe   : > { %1156 = vmatmul.msk.f32.vlgmr.msra.gmra.mxu0 %vm610_vm3, %v788_v45 }
 0x303   : > { %v789_v46 = vpop.f32.mrf.mxu3 }
 0x304   : > { %v790_v47 = vadd.f32 %v789_v46, %v750_v43 }
 0x306   : > { %1157 = vmatmul.msk.f32.gmra.mxu0 %vm610_vm3, %v790_v47 }
 0x37b   : > { %v815_v48 = vpop.f32.mrf.mxu0 }
 0x37c   : > { %v821_v49 = vsub.f32 %v788_v45, %v815_v48 }
 0x37e   : > { %v823_v50 = vmul.f32 %v821_v49, %v821_v49 }
 0x380   : > { %1158 = vmatmul.msk.f32.vlgmr.msra.gmra.mxu1 %vm610_vm3, %v823_v50  ;;  %v1227_v50 = vld [vmem:[%s1513_s10] ss:$0 sm:$0xff] }
 0x383   : > { %v818_v51 = vpop.f32.mrf.mxu0 }
 0x384   : > { %v822_v52 = vsub.f32 %v790_v47, %v818_v51 }
 0x386   : > { %v824_v53 = vmul.f32 %v822_v52, %v822_v52 }
 0x388   : > { %1159 = vmatmul.msk.f32.gmra.mxu1 %vm610_vm3, %v824_v53 }
 0x3fd   : > { %v848_v54 = vpop.f32.mrf.mxu1 }
 0x3fe   : > { %v849_v55 = vadd.f32 1e-05, %v848_v54 }
 0x400   : > { %1240 = vrsqrt.f32 %v849_v55  ;;  %vm860_vm5 = vweird.f32 %v849_v55 }
 0x405   : > { %v851_v56 = vpop.f32.mrf.mxu1 }
 0x406   : > { %v1241_v57 = vpop.eup %1240  ;;  %v852_v58 = vadd.f32 1e-05, %v851_v56  ;;  %v976_v56 = vld [vmem:[#allocation5] sm:$0xff] }
 0x407   : > { %v855_v59 = vmul.f32 %v1241_v57, %v849_v55  ;;  %vm861_vm4 = vweird.f32 %v1241_v57  ;;  %v988_v55 = vpop.trf.xlu0 }
 0x408   : > { %1242 = vrsqrt.f32 %v852_v58  ;;  %vm862_vm6 = vmor %vm860_vm5, %vm861_vm4  ;;  %vm870_vm8 = vweird.f32 %v852_v58 }
 0x409   : > { %v856_v60 = vmul.f32 %v1241_v57, %v855_v59  ;;  %v977_v59 = vld [vmem:[#allocation5 + $0x8] sm:$0xff] }
 0x40b   : > { %v857_v61 = vmul.f32 0.5, %v856_v60 }
 0x40d   : > { %v858_v63 = vsub.f32 1.5, %v857_v61 }
 0x40e   : > { %v1243_v1 = vpop.eup %1242 }
 0x40f   : > { %v859_v2 = vmul.f32 %v1241_v57, %v858_v63  ;;  %v865_v3 = vmul.f32 %v1243_v1, %v852_v58  ;;  %vm871_vm7 = vweird.f32 %v1243_v1 }
 0x410   : > { %vm872_vm9 = vmor %vm870_vm8, %vm871_vm7 }
 0x411   : > { %v863_v5 = vsel %vm862_vm6, %v1241_v57, %v859_v2  ;;  %v866_v6 = vmul.f32 %v1243_v1, %v865_v3 }
 0x412   : > { %v874_v8 = vmul.f32 %v863_v5, %v821_v49 }
 0x413   : > { %v867_v10 = vmul.f32 0.5, %v866_v6 }
 0x414   : > { %v877_v11 = vmul.f32 %v876_v4, %v874_v8 }
 0x415   : > { %v868_v12 = vsub.f32 1.5, %v867_v10 }
 0x416   : > { %v880_v14 = vadd.f32 %v879_v9, %v877_v11 }
 0x417   : > { %v869_v15 = vmul.f32 %v1243_v1, %v868_v12 }
 0x418   : > { %v1160_v16 = vmul.f32 -1.442695, %v880_v14 }
 0x419   : > { %v873_v17 = vsel %vm872_vm9, %v1243_v1, %v869_v15 }
 0x41a   : > { %1244 = vpow2.f32 %v1160_v16  ;;  %v875_v18 = vmul.f32 %v873_v17, %v822_v52 }
 0x41c   : > { %v878_v19 = vmul.f32 %v876_v4, %v875_v18 }
 0x41e   : > { %v881_v27 = vadd.f32 %v879_v9, %v878_v19 }
 0x420   : > { %v1245_v20 = vpop.eup %1244  ;;  %v1161_v21 = vmul.f32 -1.442695, %v881_v27 }
 0x421   : > { %v888_v22 = vadd.f32 1.0, %v1245_v20 }
 0x422   : > { %1246 = vpow2.f32 %v1161_v21 }
 0x423   : > { %1248 = vrcp.f32 %v888_v22  ;;  %v901_v33 = vand.u32 2147483648, %v888_v22  ;;  %vm895_vm11 = vweird.f32 %v888_v22  ;;  %v899_v34 = vand.u32 2147483647, %v888_v22 }
 0x425   : > { %v902_v40 = vor.u32 1.1754944e-38, %v901_v33  ;;  %vm900_vm14 = vcmp.eq.f32.partialorder %v899_v34, 8.507059e+37 }
 0x428   : > { %v1247_v23 = vpop.eup %1246 }
 0x429   : > { %v1249_v24 = vpop.eup %1248  ;;  %v889_v25 = vadd.f32 1.0, %v1247_v23 }
 0x42a   : > { %v891_v26 = vmul.f32 %v1249_v24, %v888_v22  ;;  %vm896_vm10 = vweird.f32 %v1249_v24 }
 0x42b   : > { %1250 = vrcp.f32 %v889_v25  ;;  %vm897_vm12 = vmor %vm895_vm11, %vm896_vm10  ;;  %v916_v36 = vand.u32 2147483648, %v889_v25  ;;  %v914_v39 = vand.u32 2147483647, %v889_v25  ;;  %vm910_vm15 = vweird.f32 %v889_v25 }
 0x42c   : > { %v892_v28 = vsub.f32 1.0, %v891_v26 }
 0x42d   : > { %v917_v43 = vor.u32 1.1754944e-38, %v916_v36  ;;  %vm915_vm2 = vcmp.eq.f32.partialorder %v914_v39, 8.507059e+37 }
 0x42e   : > { %v893_v29 = vmul.f32 %v1249_v24, %v892_v28 }
 0x430   : > { %v894_v31 = vadd.f32 %v1249_v24, %v893_v29 }
 0x431   : > { %v1251_v30 = vpop.eup %1250 }
 0x432   : > { %v906_v32 = vmul.f32 %v1251_v30, %v889_v25  ;;  %v898_v37 = vsel %vm897_vm12, %v1249_v24, %v894_v31  ;;  %vm911_vm13 = vweird.f32 %v1251_v30 }
 0x433   : > { %v903_v42 = vsel %vm900_vm14, %v902_v40, %v898_v37  ;;  %vm912_vm1 = vmor %vm910_vm15, %vm911_vm13 }
 0x434   : > { %v907_v35 = vsub.f32 1.0, %v906_v32  ;;  %v920_v46 = vmul.f32 %v903_v42, %v880_v14 }
 0x436   : > { %v908_v38 = vmul.f32 %v1251_v30, %v907_v35 }
 0x438   : > { %v909_v41 = vadd.f32 %v1251_v30, %v908_v38 }
 0x43a   : > { %v913_v44 = vsel %vm912_vm1, %v1251_v30, %v909_v41 }
 0x43b   : > { %v918_v45 = vsel %vm915_vm2, %v917_v43, %v913_v44 }
 0x43c   : > { %v921_v47 = vmul.f32 %v918_v45, %v881_v27 }
 0x43e   : > { %v922_v48 = vpack.c.bf16 %v921_v47, %v920_v46 }
 0x440   : > { %1178 = vmatmul.msk.bf16.vlgmr.msra.gmra.mxu2 %vm610_vm3, %v922_v48 }
 0x4c3   : > { %v971_v49 = vpop.f32.mrf.mxu2 }
 0x4c4   : > { %v972_v52 = vadd.f32 %v1227_v50, %v971_v49 }
 0x4cb   : > { %v973_v51 = vpop.f32.mrf.mxu2 }
 0x4cc   : > { %v974_v53 = vadd.f32 %v1227_v50, %v973_v51 }
 0x4ce   : > { %v978_v54 = vpack.c.bf16 %v974_v53, %v972_v52 }
 0x4d0   : > { %1006 = vmatpush.bf16.msra.mxu3 %v978_v54 }
 0x4d3   : > { %1179 = vmatmul.msk.bf16.vlgmr.msra.gmra.mxu3 %vm482_vm0, %v988_v55 }
 0x556   : > { %v1008_v57 = vpop.f32.mrf.mxu3 }
 0x557   : > { %v1013_v58 = vadd.f32 %v1008_v57, %v976_v56 }
 0x559   : > { %1015 = vst [vmem:[#allocation5] sm:$0xff] %v1013_v58 }
 0x55e   : > { %v1010_v60 = vpop.f32.mrf.mxu3 }
 0x55f   : > { %v1014_v61 = vadd.f32 %v1010_v60, %v977_v59 }
 0x561   : > { %1016 = vst [vmem:[#allocation5 + $0x8] sm:$0xff] %v1014_v61 }
 0x562   : > { %1200 = dma.vmem_to_hbm [thread:$0]  (%p1209_p8), %s1023_s23, 256, %s1025_s27, [#allocation4], %s1331_s28, %s1331_s28, %s1332_s29  }
 0x563   : > { %1319 = dma.done.wait (%p1209_p8), [#allocation4], 256  }
 0x564   : > { %1321 = vsyncadd (%p1209_p8), [#allocation4], 4294967040 }
 0x565 PF: > { %s24_s21 = sadd.s32 1, %s1324_s21  }
 0x566   : > { %p21_p9 = scmp.ge.s32.totalorder %s24_s21, 5  }
 0x568   :  { %23 = sbr.rel (!%p21_p9) target bundleno = 2 (0x2), region = 110 }
 0x56d   :  { %1041 = vsyncpa [#allocation3], 1 }
 0x56e   :  { %1043 = vsyncpa [#allocation3 + $0x1], 1 }
 0x56f   :  { %1044 = vsyncpa [#allocation4], 1 }
 0x570   :  { %1046 = vsyncpa [#allocation4 + $0x1], 1 }

</bundles_post_ra>
